<compile_context>
chip_gen: v5e
topology: v5e:2x2
jax: 0.10.0
libtpu: 0.0.40
codegen_flags: <defaults>
</compile_context>

<pallas_src>
import functools

import jax
import jax.numpy as jnp
from jax.experimental import pallas as pl
from jax.experimental.pallas import tpu as pltpu

LEAKY_SLOPE = 0.01
BN_EPS = 1e-5
CP = 128  # lane (channel/K) padding target


# ----------------------------------------------------------------------------- helpers
def _ceil_to(n, m):
    return ((n + m - 1) // m) * m


def _lane_pad(v):
    """1-D vector -> (1, 128) f32, zero padded (padded lanes stay exactly 0 downstream)."""
    v = jnp.asarray(v, jnp.float32).reshape(-1)
    return jnp.pad(v, (0, CP - v.shape[0])).reshape(1, CP)


def _conv_weight_mat(w_oikk):
    """(Cout, Cin, kh, kw) -> (128, 128) bf16 with rows ordered (tap i, tap j, cin)."""
    Cout, Cin, kh, kw = (int(s) for s in w_oikk.shape)
    wm = jnp.transpose(w_oikk, (2, 3, 1, 0)).reshape(kh * kw * Cin, Cout)
    return jnp.pad(wm, ((0, CP - kh * kw * Cin), (0, CP - Cout))).astype(jnp.bfloat16)


def _im2col(x_nhwc, cin, kh, kw, stride, pad):
    """K-folded im2col: (N,H,W,>=cin) -> (M_pad, 128) bf16 with K = kh*kw*cin <= 128."""
    x = x_nhwc[..., :cin]
    N, H, W, _ = x.shape
    xp = jnp.pad(x, ((0, 0), (pad, pad), (pad, pad), (0, 0)))
    Hp, Wp = H + 2 * pad, W + 2 * pad
    Ho = (Hp - kh) // stride + 1
    Wo = (Wp - kw) // stride + 1
    M = N * Ho * Wo
    K = kh * kw * cin
    assert K <= CP, "taps do not fold into a single K tile at this size"
    cols = []
    for i in range(kh):
        for j in range(kw):
            win = xp[:, i:i + (Ho - 1) * stride + 1:stride,
                        j:j + (Wo - 1) * stride + 1:stride, :]
            cols.append(win.reshape(M, cin))
    L = jnp.concatenate(cols, axis=1)                       # (M, K)
    Mp = _ceil_to(M, 8)
    L = jnp.pad(L, ((0, Mp - M), (0, CP - K))).astype(jnp.bfloat16)
    return L, (N, Ho, Wo, M)


# ------------------------------------------------- fused conv kernel (1 matmul + epilogue)
def _conv_fused_kernel(x_ref, w_ref, g_ref, b_ref, o_ref, *, rows, cout, planes, post):
    """One conv layer: single MXU matmul (taps folded into K) + fused epilogue.

    post == "bn_lrelu": training-mode BatchNorm (single-pass sum / sum-of-squares, biased
        variance) + LeakyReLU.  The conv bias is omitted: it cancels exactly under
        train-mode BN.  Zero-padded rows contribute 0 to both sums, so we just divide by
        the true pixel count `rows`.  If planes > 1 the lanes hold `planes` sub-pixel
        parity planes packed as [plane * cout + c]; per-channel statistics are combined
        across plane groups with XLU lane rotations.
    post == "tanh": bias + tanh (no BN).
    """
    acc = jnp.dot(x_ref[...], w_ref[...], preferred_element_type=jnp.float32)

    if post == "tanh":
        o_ref[...] = jnp.tanh(acc + b_ref[...]).astype(o_ref.dtype)
        return

    s1 = jnp.sum(acc, axis=0, keepdims=True)
    s2 = jnp.sum(acc * acc, axis=0, keepdims=True)
    st = jnp.concatenate([s1, s2], axis=0)                  # (2, 128)
    if planes > 1:
        # gather: lane c += lanes c + k*cout  (wraparound lanes are masked right after)
        tot = st
        for k in range(1, planes):
            tot = tot + pltpu.roll(st, shift=(CP - k * cout) % CP, axis=1)
        lane = jax.lax.broadcasted_iota(jnp.int32, tot.shape, 1)
        tot = jnp.where(lane < cout, tot, 0.0)
        # scatter the combined per-channel totals back to every plane group
        st = tot
        for k in range(1, planes):
            st = st + pltpu.roll(tot, shift=k * cout, axis=1)

    mean = st[0:1] * (1.0 / rows)
    var = jnp.maximum(st[1:2] * (1.0 / rows) - mean * mean, 0.0)
    scale = g_ref[...] * jax.lax.rsqrt(var + BN_EPS)        # padded lanes: gamma = 0 -> 0
    shift = b_ref[...] - mean * scale
    y = acc * scale + shift
    o_ref[...] = jnp.where(y > 0, y, LEAKY_SLOPE * y).astype(o_ref.dtype)


def _conv_call(L, Wm, g, b, *, rows, cout, planes, post, out_dtype):
    Mp = L.shape[0]
    kern = functools.partial(_conv_fused_kernel, rows=rows, cout=cout,
                             planes=planes, post=post)
    return pl.pallas_call(
        kern,
        out_shape=jax.ShapeDtypeStruct((Mp, CP), out_dtype),
        grid=(1,),
        in_specs=[pl.BlockSpec((Mp, CP), lambda i: (0, 0)),
                  pl.BlockSpec((CP, CP), lambda i: (0, 0)),
                  pl.BlockSpec((1, CP), lambda i: (0, 0)),
                  pl.BlockSpec((1, CP), lambda i: (0, 0))],
        out_specs=pl.BlockSpec((Mp, CP), lambda i: (0, 0)),
    )(L, Wm, g, b)


# -------------------------------------------------------------- layer wrappers (XLA glue)
def conv2d_fused(x_nhwc, w_oikk, gamma, beta, *, stride, pad, post, bias=None):
    """PyTorch Conv2d (+BN+LeakyReLU in training mode, or +bias+tanh).  NHWC in/out."""
    Cout, Cin, kh, kw = (int(s) for s in w_oikk.shape)
    L, (N, Ho, Wo, M) = _im2col(x_nhwc, Cin, kh, kw, stride, pad)
    Wm = _conv_weight_mat(w_oikk)
    if post == "bn_lrelu":
        g, b, out_dtype = _lane_pad(gamma), _lane_pad(beta), jnp.bfloat16
    else:  # tanh
        g, b, out_dtype = jnp.zeros((1, CP), jnp.float32), _lane_pad(bias), jnp.float32
    out = _conv_call(L, Wm, g, b, rows=M, cout=Cout, planes=1, post=post,
                     out_dtype=out_dtype)
    return out[:M, :Cout].reshape(N, Ho, Wo, Cout)


def conv_transpose2d_subpixel_fused(x_nhwc, w_iokk, gamma, beta):
    """PyTorch ConvTranspose2d(k=3, s=2, p=1, output_padding=1) + BN + LeakyReLU.

    Sub-pixel decomposition: the 4 output parity planes are packed into the lane
    dimension so the whole layer is ONE (M,128)x(128,128) matmul; no structural zeros.
    """
    Cin, Cout, kh, kw = (int(s) for s in w_iokk.shape)
    assert kh == 3 and kw == 3
    N, H, W, _ = x_nhwc.shape
    x = x_nhwc[..., :Cin]
    xp = jnp.pad(x, ((0, 0), (0, 1), (0, 1), (0, 0)))       # zero row/col for (u+1, v+1) taps
    M = N * H * W
    K = 4 * Cin
    assert K <= CP and 4 * Cout <= CP
    cols = [xp[:, di:di + H, dj:dj + W, :].reshape(M, Cin)
            for (di, dj) in ((0, 0), (0, 1), (1, 0), (1, 1))]
    L = jnp.concatenate(cols, axis=1)
    Mp = _ceil_to(M, 8)
    L = jnp.pad(L, ((0, Mp - M), (0, CP - K))).astype(jnp.bfloat16)

    # plane p = a*2 + b produces output pixel (2u+a, 2v+b); taps are (ky, kx, di, dj)
    plane_taps = {
        0: ((1, 1, 0, 0),),
        1: ((1, 2, 0, 0), (1, 0, 0, 1)),
        2: ((2, 1, 0, 0), (0, 1, 1, 0)),
        3: ((2, 2, 0, 0), (2, 0, 0, 1), (0, 2, 1, 0), (0, 0, 1, 1)),
    }
    R = jnp.zeros((CP, CP), jnp.float32)
    for p, taps in plane_taps.items():
        for ky, kx, di, dj in taps:
            o = di * 2 + dj
            R = R.at[o * Cin:(o + 1) * Cin, p * Cout:(p + 1) * Cout].add(w_iokk[:, :, ky, kx])
    Wm = R.astype(jnp.bfloat16)

    g = _lane_pad(jnp.tile(jnp.asarray(gamma, jnp.float32), 4))
    b = _lane_pad(jnp.tile(jnp.asarray(beta, jnp.float32), 4))

    out = _conv_call(L, Wm, g, b, rows=4 * M, cout=Cout, planes=4, post="bn_lrelu",
                     out_dtype=jnp.bfloat16)
    # TODO(synk): depth-to-space interleave still runs as one tiny XLA transpose between
    # kernels; writing parity planes straight into (N,2H,2W,C) needs a lane scatter.
    y = out[:M, :4 * Cout].reshape(N, H, W, 2, 2, Cout)
    y = jnp.transpose(y, (0, 1, 3, 2, 4, 5)).reshape(N, 2 * H, 2 * W, Cout)
    return y


def conv_transpose2d_dilated_fused(x_nhwc, w_iokk, gamma, beta, *, out_pad):
    """PyTorch ConvTranspose2d(k=3, s=2, p=1, output_padding=out_pad) via zero-dilation +
    stride-1 conv (single K-folded matmul), fused with BN + LeakyReLU.  Used only for the
    final output_padding=0 layer (its parity planes have unequal sizes)."""
    # TODO(synk): this layer still multiplies the dilation's structural zeros; a sub-pixel
    # decomposition with per-plane row counts would save ~4x MACs here.
    Cin, Cout, kh, kw = (int(s) for s in w_iokk.shape)
    N, H, W, _ = x_nhwc.shape
    x = x_nhwc[..., :Cin]
    Hd, Wd = (H - 1) * 2 + 1, (W - 1) * 2 + 1
    xd = jnp.zeros((N, Hd, Wd, Cin), x.dtype).at[:, ::2, ::2, :].set(x)
    p0 = kh - 1 - 1                                          # k-1-pad, pad = 1
    xp = jnp.pad(xd, ((0, 0), (p0, p0 + out_pad), (p0, p0 + out_pad), (0, 0)))
    # equivalent forward-conv weight: flip spatially, swap in/out channel axes
    w_conv = jnp.transpose(w_iokk[:, :, ::-1, ::-1], (1, 0, 2, 3))
    return conv2d_fused(xp, w_conv, gamma, beta, stride=1, pad=0, post="bn_lrelu")


# --------------------------------------- fused latent path: fc_mu|fc_var + reparam + fc
def _latent_kernel(flat_ref, wmv_ref, bmv_ref, eps_ref, wd_ref, bd_ref,
                   mu_ref, lv_ref, z_ref, d_ref):
    flat = flat_ref[...]
    mv = jnp.dot(flat, wmv_ref[...], preferred_element_type=jnp.float32) + bmv_ref[...]
    mu = mv[:, :CP]            # lanes 0..127: fc_mu
    lv = mv[:, CP:]            # lanes 128..255: fc_var
    z = eps_ref[...] * jnp.exp(0.5 * lv) + mu
    d = jnp.dot(z, wd_ref[...], preferred_element_type=jnp.float32) + bd_ref[...]
    mu_ref[...] = mu
    lv_ref[...] = lv
    z_ref[...] = z
    d_ref[...] = d.astype(d_ref.dtype)


def latent_fused(flat, wmu, bmu, wvar, bvar, eps, wdec, bdec):
    """fc_mu + fc_var (one widened (128,256) matmul) + reparameterization + decoder_input.
    Kept f32 end-to-end: exp(0.5*log_var) amplifies bf16 error and these matmuls are tiny."""
    N, F = flat.shape
    lat = int(wmu.shape[0])
    feat = int(wdec.shape[0])
    Bp = _ceil_to(N, 8)
    flat_p = jnp.pad(flat.astype(jnp.float32), ((0, Bp - N), (0, CP - F)))
    eps_p = jnp.pad(eps.astype(jnp.float32), ((0, Bp - N), (0, CP - lat)))
    wmv = jnp.zeros((CP, 2 * CP), jnp.float32)
    wmv = wmv.at[:F, :lat].set(wmu.T).at[:F, CP:CP + lat].set(wvar.T)
    bmv = jnp.zeros((1, 2 * CP), jnp.float32)
    bmv = bmv.at[0, :lat].set(bmu).at[0, CP:CP + lat].set(bvar)
    wd = jnp.zeros((CP, CP), jnp.float32).at[:lat, :feat].set(wdec.T)
    bd = jnp.zeros((1, CP), jnp.float32).at[0, :feat].set(bdec)

    mat = pl.BlockSpec((Bp, CP), lambda i: (0, 0))
    mu_p, lv_p, z_p, d_p = pl.pallas_call(
        _latent_kernel,
        out_shape=(jax.ShapeDtypeStruct((Bp, CP), jnp.float32),
                   jax.ShapeDtypeStruct((Bp, CP), jnp.float32),
                   jax.ShapeDtypeStruct((Bp, CP), jnp.float32),
                   jax.ShapeDtypeStruct((Bp, CP), jnp.bfloat16)),
        grid=(1,),
        in_specs=[mat,
                  pl.BlockSpec((CP, 2 * CP), lambda i: (0, 0)),
                  pl.BlockSpec((1, 2 * CP), lambda i: (0, 0)),
                  mat,
                  pl.BlockSpec((CP, CP), lambda i: (0, 0)),
                  pl.BlockSpec((1, CP), lambda i: (0, 0))],
        out_specs=(mat, mat, mat, mat),
    )(flat_p, wmv, bmv, eps_p, wd, bd)
    return mu_p[:N, :lat], lv_p[:N, :lat], z_p[:N, :lat], d_p[:N, :feat]


# ----------------------------------------------------------------------------- params
def init_params(key, in_channels, latent_dim, hidden_dims):
    keys = iter(jax.random.split(key, 64))

    def nrm(shape, scale=0.05):
        return scale * jax.random.normal(next(keys), shape, dtype=jnp.float32)

    params = {}
    enc, c_in = [], in_channels
    for h in hidden_dims:
        # NOTE: conv biases are kept for structural fidelity but are unused in the kernels:
        # they cancel exactly under training-mode BatchNorm.
        enc.append({"w": nrm((h, c_in, 3, 3)), "b": nrm((h,)),
                    "gamma": jnp.ones((h,), jnp.float32),
                    "beta": jnp.zeros((h,), jnp.float32)})
        c_in = h
    params["encoder"] = enc
    feat = hidden_dims[-1] * 4
    params["fc_mu"] = {"w": nrm((latent_dim, feat)), "b": nrm((latent_dim,))}
    params["fc_var"] = {"w": nrm((latent_dim, feat)), "b": nrm((latent_dim,))}
    params["decoder_input"] = {"w": nrm((feat, latent_dim)), "b": nrm((feat,))}
    hrev = list(reversed(hidden_dims))
    dec = []
    for i in range(len(hrev) - 1):
        dec.append({"w": nrm((hrev[i], hrev[i + 1], 3, 3)), "b": nrm((hrev[i + 1],)),
                    "gamma": jnp.ones((hrev[i + 1],), jnp.float32),
                    "beta": jnp.zeros((hrev[i + 1],), jnp.float32)})
    params["decoder"] = dec
    last = hrev[-1]
    params["final"] = {"ct_w": nrm((last, last, 3, 3)), "ct_b": nrm((last,)),
                       "gamma": jnp.ones((last,), jnp.float32),
                       "beta": jnp.zeros((last,), jnp.float32),
                       "conv_w": nrm((1, last, 4, 4)), "conv_b": nrm((1,))}
    return params


# ----------------------------------------------------------------------------- forward
def vae_forward(params, x_nchw, eps_key, hidden_dims):
    x = jnp.transpose(x_nchw, (0, 2, 3, 1)).astype(jnp.float32)     # NCHW -> NHWC

    # ---- encode: fused Conv + BN(train) + LeakyReLU per layer ----
    h = x
    for layer in params["encoder"]:
        h = conv2d_fused(h, layer["w"], layer["gamma"], layer["beta"],
                         stride=2, pad=1, post="bn_lrelu")
    N, Hh, Wh, C = h.shape
    F = C * Hh * Wh
    latent_dim = int(params["fc_mu"]["w"].shape[0])
    assert F <= CP and latent_dim <= CP
    # torch.flatten(start_dim=1) on NCHW flattens in (C, H, W) order
    flat = jnp.transpose(h, (0, 3, 1, 2)).reshape(N, F)

    # ---- fused fc_mu | fc_var / reparameterize / decoder_input ----
    eps = jax.random.normal(eps_key, (N, latent_dim), dtype=jnp.float32)
    mu, log_var, z, d = latent_fused(
        flat, params["fc_mu"]["w"], params["fc_mu"]["b"],
        params["fc_var"]["w"], params["fc_var"]["b"],
        eps, params["decoder_input"]["w"], params["decoder_input"]["b"])

    # ---- decode ----
    hrev = list(reversed(hidden_dims))
    # TODO(synk): reference hard-codes result.view(-1, 265, 2, 2), inconsistent with
    # hidden_dims[-1]*4 features; we use hidden_dims[-1] channels (the obvious intent).
    d = d.reshape(N, hrev[0], 2, 2)                  # NCHW
    d = jnp.transpose(d, (0, 2, 3, 1))               # -> NHWC
    for layer in params["decoder"]:
        d = conv_transpose2d_subpixel_fused(d, layer["w"], layer["gamma"], layer["beta"])
    f = params["final"]
    d = conv_transpose2d_dilated_fused(d, f["ct_w"], f["gamma"], f["beta"], out_pad=0)
    d = conv2d_fused(d, f["conv_w"], None, None, stride=1, pad=0, post="tanh",
                     bias=f["conv_b"])
    recons = jnp.transpose(d, (0, 3, 1, 2))          # NHWC -> NCHW
    return [recons, x_nchw, mu, log_var, z]


# ----------------------------------------------------------------------------- main
if __name__ == "__main__":
    in_channels = 1
    latent_dim = 16
    hidden_dims = [8, 16]          # 2 stride-2 convs: 8x8 input -> 2x2 encoder output
    B, H = 2, 8

    x = jax.random.normal(jax.random.PRNGKey(0), (B, in_channels, H, H), dtype=jnp.float32)
    params = init_params(jax.random.PRNGKey(42), in_channels, latent_dim, hidden_dims)

    fwd = jax.jit(functools.partial(vae_forward, hidden_dims=hidden_dims))
    outs = fwd(params, x, jax.random.PRNGKey(123))
    outs = jax.block_until_ready(outs)

    recons, inp, mu, log_var, z = outs
    assert recons.shape == (B, 1, 4, 4)
    assert mu.shape == (B, latent_dim) and log_var.shape == (B, latent_dim)
    assert z.shape == (B, latent_dim)
    assert jnp.all(jnp.isfinite(recons))
    assert jnp.all(jnp.isfinite(mu)) and jnp.all(jnp.isfinite(z))
    print("KERNEL_OK")
</pallas_src>

<mosaic_0001>
module attributes {stable_mosaic.version = 11 : i64} {
  func.func @_conv_fused_kernel(%arg0: i32, %arg1: memref<32x128xbf16, #tpu.memory_space<vmem>>, %arg2: memref<128x128xbf16, #tpu.memory_space<vmem>>, %arg3: memref<1x128xf32, #tpu.memory_space<vmem>>, %arg4: memref<1x128xf32, #tpu.memory_space<vmem>>, %arg5: memref<32x128xbf16, #tpu.memory_space<vmem>>) attributes {dimension_semantics = [#tpu.dimension_semantics<arbitrary>], iteration_bounds = array<i64: 1>, scalar_prefetch = 0 : i64, scratch_operands = 0 : i64, tpu.core_type = #tpu.core_type<tc>, window_params = [{pipeline_mode = #tpu.pipeline_mode<synchronous>, transform_indices = @transform_0, window_bounds = array<i64: 32, 128>}, {pipeline_mode = #tpu.pipeline_mode<synchronous>, transform_indices = @transform_1, window_bounds = array<i64: 128, 128>}, {pipeline_mode = #tpu.pipeline_mode<synchronous>, transform_indices = @transform_2, window_bounds = array<i64: 1, 128>}, {pipeline_mode = #tpu.pipeline_mode<synchronous>, transform_indices = @transform_3, window_bounds = array<i64: 1, 128>}, {pipeline_mode = #tpu.pipeline_mode<synchronous>, transform_indices = @transform_4, window_bounds = array<i64: 32, 128>}]} {
    %c0 = arith.constant 0 : index
    %c0_0 = arith.constant 0 : index
    %0 = vector.load %arg1[%c0, %c0_0] : memref<32x128xbf16, #tpu.memory_space<vmem>>, vector<32x128xbf16>
    %c0_1 = arith.constant 0 : index
    %c0_2 = arith.constant 0 : index
    %1 = vector.load %arg2[%c0_1, %c0_2] : memref<128x128xbf16, #tpu.memory_space<vmem>>, vector<128x128xbf16>
    %cst = arith.constant dense<0.000000e+00> : vector<32x128xf32>
    %2 = tpu.matmul %0, %1, %cst {dimension_numbers = #tpu.dot_dimension_numbers<[1], [0], [0], [1], [0, 0, 1, 1], [], []>} : vector<32x128xbf16>, vector<128x128xbf16>, vector<32x128xf32> -> vector<32x128xf32>
    %cst_3 = arith.constant dense<0.000000e+00> : vector<128xf32>
    %3 = vector.multi_reduction <add>, %2, %cst_3 [0] : vector<32x128xf32> to vector<128xf32>
    %4 = vector.shape_cast %3 : vector<128xf32> to vector<1x128xf32>
    %5 = arith.mulf %2, %2 : vector<32x128xf32>
    %cst_4 = arith.constant dense<0.000000e+00> : vector<128xf32>
    %6 = vector.multi_reduction <add>, %5, %cst_4 [0] : vector<32x128xf32> to vector<128xf32>
    %7 = vector.shape_cast %6 : vector<128xf32> to vector<1x128xf32>
    %8 = tpu.concatenate %4, %7 in 0 : vector<1x128xf32>, vector<1x128xf32> -> vector<2x128xf32>
    %9 = vector.extract_strided_slice %8 {offsets = [0, 0], sizes = [1, 128], strides = [1, 1]} : vector<2x128xf32> to vector<1x128xf32>
    %cst_5 = arith.constant 3.125000e-02 : f32
    %10 = vector.broadcast %cst_5 : f32 to vector<1x128xf32>
    %11 = arith.mulf %9, %10 : vector<1x128xf32>
    %12 = vector.extract_strided_slice %8 {offsets = [1, 0], sizes = [1, 128], strides = [1, 1]} : vector<2x128xf32> to vector<1x128xf32>
    %cst_6 = arith.constant 3.125000e-02 : f32
    %13 = vector.broadcast %cst_6 : f32 to vector<1x128xf32>
    %14 = arith.mulf %12, %13 : vector<1x128xf32>
    %15 = arith.mulf %11, %11 : vector<1x128xf32>
    %16 = arith.subf %14, %15 : vector<1x128xf32>
    %cst_7 = arith.constant 0.000000e+00 : f32
    %17 = vector.broadcast %cst_7 : f32 to vector<1x128xf32>
    %18 = arith.maximumf %16, %17 : vector<1x128xf32>
    %c0_8 = arith.constant 0 : index
    %c0_9 = arith.constant 0 : index
    %19 = vector.load %arg3[%c0_8, %c0_9] : memref<1x128xf32, #tpu.memory_space<vmem>>, vector<1x128xf32>
    %cst_10 = arith.constant 9.99999974E-6 : f32
    %20 = vector.broadcast %cst_10 : f32 to vector<1x128xf32>
    %21 = arith.addf %18, %20 : vector<1x128xf32>
    %22 = math.rsqrt %21 : vector<1x128xf32>
    %23 = arith.mulf %19, %22 : vector<1x128xf32>
    %c0_11 = arith.constant 0 : index
    %c0_12 = arith.constant 0 : index
    %24 = vector.load %arg4[%c0_11, %c0_12] : memref<1x128xf32, #tpu.memory_space<vmem>>, vector<1x128xf32>
    %25 = arith.mulf %11, %23 : vector<1x128xf32>
    %26 = arith.subf %24, %25 : vector<1x128xf32>
    %27 = vector.broadcast %23 : vector<1x128xf32> to vector<32x128xf32>
    %28 = arith.mulf %2, %27 : vector<32x128xf32>
    %29 = vector.broadcast %26 : vector<1x128xf32> to vector<32x128xf32>
    %30 = arith.addf %28, %29 : vector<32x128xf32>
    %cst_13 = arith.constant 0.000000e+00 : f32
    %31 = vector.broadcast %cst_13 : f32 to vector<32x128xf32>
    %32 = arith.cmpf ogt, %30, %31 : vector<32x128xf32>
    %cst_14 = arith.constant 0.00999999977 : f32
    %33 = vector.broadcast %cst_14 : f32 to vector<32x128xf32>
    %34 = arith.mulf %33, %30 : vector<32x128xf32>
    %35 = arith.select %32, %30, %34 : vector<32x128xi1>, vector<32x128xf32>
    %36 = arith.truncf %35 : vector<32x128xf32> to vector<32x128xbf16>
    %c0_15 = arith.constant 0 : index
    %c0_16 = arith.constant 0 : index
    %37 = vector.load %arg5[%c0_15, %c0_16] : memref<32x128xbf16, #tpu.memory_space<vmem>>, vector<32x128xbf16>
    tpu.vector_store %arg5[%c0_15, %c0_16], %36 {strides = array<i32>} : memref<32x128xbf16, #tpu.memory_space<vmem>>, vector<32x128xbf16>,
    return
  }
  func.func @transform_0(%arg0: i32) -> (i32, i32) {
    %c0_i32 = arith.constant 0 : i32
    %c0_i32_0 = arith.constant 0 : i32
    %c0_i32_1 = arith.constant 0 : i32
    return %c0_i32, %c0_i32_0 : i32, i32
  }
  func.func @transform_1(%arg0: i32) -> (i32, i32) {
    %c0_i32 = arith.constant 0 : i32
    %c0_i32_0 = arith.constant 0 : i32
    %c0_i32_1 = arith.constant 0 : i32
    return %c0_i32, %c0_i32_0 : i32, i32
  }
  func.func @transform_2(%arg0: i32) -> (i32, i32) {
    %c0_i32 = arith.constant 0 : i32
    %c0_i32_0 = arith.constant 0 : i32
    %c0_i32_1 = arith.constant 0 : i32
    return %c0_i32, %c0_i32_0 : i32, i32
  }
  func.func @transform_3(%arg0: i32) -> (i32, i32) {
    %c0_i32 = arith.constant 0 : i32
    %c0_i32_0 = arith.constant 0 : i32
    %c0_i32_1 = arith.constant 0 : i32
    return %c0_i32, %c0_i32_0 : i32, i32
  }
  func.func @transform_4(%arg0: i32) -> (i32, i32) {
    %c0_i32 = arith.constant 0 : i32
    %c0_i32_0 = arith.constant 0 : i32
    %c0_i32_1 = arith.constant 0 : i32
    return %c0_i32, %c0_i32_0 : i32, i32
  }
}

module attributes {stable_mosaic.version = 11 : i64} {
  func.func @_conv_fused_kernel(%arg0: i32, %arg1: memref<8x128xbf16, #tpu.memory_space<vmem>>, %arg2: memref<128x128xbf16, #tpu.memory_space<vmem>>, %arg3: memref<1x128xf32, #tpu.memory_space<vmem>>, %arg4: memref<1x128xf32, #tpu.memory_space<vmem>>, %arg5: memref<8x128xbf16, #tpu.memory_space<vmem>>) attributes {dimension_semantics = [#tpu.dimension_semantics<arbitrary>], iteration_bounds = array<i64: 1>, scalar_prefetch = 0 : i64, scratch_operands = 0 : i64, tpu.core_type = #tpu.core_type<tc>, window_params = [{pipeline_mode = #tpu.pipeline_mode<synchronous>, transform_indices = @transform_0, window_bounds = array<i64: 8, 128>}, {pipeline_mode = #tpu.pipeline_mode<synchronous>, transform_indices = @transform_1, window_bounds = array<i64: 128, 128>}, {pipeline_mode = #tpu.pipeline_mode<synchronous>, transform_indices = @transform_2, window_bounds = array<i64: 1, 128>}, {pipeline_mode = #tpu.pipeline_mode<synchronous>, transform_indices = @transform_3, window_bounds = array<i64: 1, 128>}, {pipeline_mode = #tpu.pipeline_mode<synchronous>, transform_indices = @transform_4, window_bounds = array<i64: 8, 128>}]} {
    %c0 = arith.constant 0 : index
    %c0_0 = arith.constant 0 : index
    %0 = vector.load %arg1[%c0, %c0_0] : memref<8x128xbf16, #tpu.memory_space<vmem>>, vector<8x128xbf16>
    %c0_1 = arith.constant 0 : index
    %c0_2 = arith.constant 0 : index
    %1 = vector.load %arg2[%c0_1, %c0_2] : memref<128x128xbf16, #tpu.memory_space<vmem>>, vector<128x128xbf16>
    %cst = arith.constant dense<0.000000e+00> : vector<8x128xf32>
    %2 = tpu.matmul %0, %1, %cst {dimension_numbers = #tpu.dot_dimension_numbers<[1], [0], [0], [1], [0, 0, 1, 1], [], []>} : vector<8x128xbf16>, vector<128x128xbf16>, vector<8x128xf32> -> vector<8x128xf32>
    %cst_3 = arith.constant dense<0.000000e+00> : vector<128xf32>
    %3 = vector.multi_reduction <add>, %2, %cst_3 [0] : vector<8x128xf32> to vector<128xf32>
    %4 = vector.shape_cast %3 : vector<128xf32> to vector<1x128xf32>
    %5 = arith.mulf %2, %2 : vector<8x128xf32>
    %cst_4 = arith.constant dense<0.000000e+00> : vector<128xf32>
    %6 = vector.multi_reduction <add>, %5, %cst_4 [0] : vector<8x128xf32> to vector<128xf32>
    %7 = vector.shape_cast %6 : vector<128xf32> to vector<1x128xf32>
    %8 = tpu.concatenate %4, %7 in 0 : vector<1x128xf32>, vector<1x128xf32> -> vector<2x128xf32>
    %9 = vector.extract_strided_slice %8 {offsets = [0, 0], sizes = [1, 128], strides = [1, 1]} : vector<2x128xf32> to vector<1x128xf32>
    %cst_5 = arith.constant 1.250000e-01 : f32
    %10 = vector.broadcast %cst_5 : f32 to vector<1x128xf32>
    %11 = arith.mulf %9, %10 : vector<1x128xf32>
    %12 = vector.extract_strided_slice %8 {offsets = [1, 0], sizes = [1, 128], strides = [1, 1]} : vector<2x128xf32> to vector<1x128xf32>
    %cst_6 = arith.constant 1.250000e-01 : f32
    %13 = vector.broadcast %cst_6 : f32 to vector<1x128xf32>
    %14 = arith.mulf %12, %13 : vector<1x128xf32>
    %15 = arith.mulf %11, %11 : vector<1x128xf32>
    %16 = arith.subf %14, %15 : vector<1x128xf32>
    %cst_7 = arith.constant 0.000000e+00 : f32
    %17 = vector.broadcast %cst_7 : f32 to vector<1x128xf32>
    %18 = arith.maximumf %16, %17 : vector<1x128xf32>
    %c0_8 = arith.constant 0 : index
    %c0_9 = arith.constant 0 : index
    %19 = vector.load %arg3[%c0_8, %c0_9] : memref<1x128xf32, #tpu.memory_space<vmem>>, vector<1x128xf32>
    %cst_10 = arith.constant 9.99999974E-6 : f32
    %20 = vector.broadcast %cst_10 : f32 to vector<1x128xf32>
    %21 = arith.addf %18, %20 : vector<1x128xf32>
    %22 = math.rsqrt %21 : vector<1x128xf32>
    %23 = arith.mulf %19, %22 : vector<1x128xf32>
    %c0_11 = arith.constant 0 : index
    %c0_12 = arith.constant 0 : index
    %24 = vector.load %arg4[%c0_11, %c0_12] : memref<1x128xf32, #tpu.memory_space<vmem>>, vector<1x128xf32>
    %25 = arith.mulf %11, %23 : vector<1x128xf32>
    %26 = arith.subf %24, %25 : vector<1x128xf32>
    %27 = vector.broadcast %23 : vector<1x128xf32> to vector<8x128xf32>
    %28 = arith.mulf %2, %27 : vector<8x128xf32>
    %29 = vector.broadcast %26 : vector<1x128xf32> to vector<8x128xf32>
    %30 = arith.addf %28, %29 : vector<8x128xf32>
    %cst_13 = arith.constant 0.000000e+00 : f32
    %31 = vector.broadcast %cst_13 : f32 to vector<8x128xf32>
    %32 = arith.cmpf ogt, %30, %31 : vector<8x128xf32>
    %cst_14 = arith.constant 0.00999999977 : f32
    %33 = vector.broadcast %cst_14 : f32 to vector<8x128xf32>
    %34 = arith.mulf %33, %30 : vector<8x128xf32>
    %35 = arith.select %32, %30, %34 : vector<8x128xi1>, vector<8x128xf32>
    %36 = arith.truncf %35 : vector<8x128xf32> to vector<8x128xbf16>
    %c0_15 = arith.constant 0 : index
    %c0_16 = arith.constant 0 : index
    %37 = vector.load %arg5[%c0_15, %c0_16] : memref<8x128xbf16, #tpu.memory_space<vmem>>, vector<8x128xbf16>
    tpu.vector_store %arg5[%c0_15, %c0_16], %36 {strides = array<i32>} : memref<8x128xbf16, #tpu.memory_space<vmem>>, vector<8x128xbf16>,
    return
  }
  func.func @transform_0(%arg0: i32) -> (i32, i32) {
    %c0_i32 = arith.constant 0 : i32
    %c0_i32_0 = arith.constant 0 : i32
    %c0_i32_1 = arith.constant 0 : i32
    return %c0_i32, %c0_i32_0 : i32, i32
  }
  func.func @transform_1(%arg0: i32) -> (i32, i32) {
    %c0_i32 = arith.constant 0 : i32
    %c0_i32_0 = arith.constant 0 : i32
    %c0_i32_1 = arith.constant 0 : i32
    return %c0_i32, %c0_i32_0 : i32, i32
  }
  func.func @transform_2(%arg0: i32) -> (i32, i32) {
    %c0_i32 = arith.constant 0 : i32
    %c0_i32_0 = arith.constant 0 : i32
    %c0_i32_1 = arith.constant 0 : i32
    return %c0_i32, %c0_i32_0 : i32, i32
  }
  func.func @transform_3(%arg0: i32) -> (i32, i32) {
    %c0_i32 = arith.constant 0 : i32
    %c0_i32_0 = arith.constant 0 : i32
    %c0_i32_1 = arith.constant 0 : i32
    return %c0_i32, %c0_i32_0 : i32, i32
  }
  func.func @transform_4(%arg0: i32) -> (i32, i32) {
    %c0_i32 = arith.constant 0 : i32
    %c0_i32_0 = arith.constant 0 : i32
    %c0_i32_1 = arith.constant 0 : i32
    return %c0_i32, %c0_i32_0 : i32, i32
  }
}

module attributes {stable_mosaic.version = 11 : i64} {
  func.func @_latent_kernel(%arg0: i32, %arg1: memref<8x128xf32, #tpu.memory_space<vmem>>, %arg2: memref<128x256xf32, #tpu.memory_space<vmem>>, %arg3: memref<1x256xf32, #tpu.memory_space<vmem>>, %arg4: memref<8x128xf32, #tpu.memory_space<vmem>>, %arg5: memref<128x128xf32, #tpu.memory_space<vmem>>, %arg6: memref<1x128xf32, #tpu.memory_space<vmem>>, %arg7: memref<8x128xf32, #tpu.memory_space<vmem>>, %arg8: memref<8x128xf32, #tpu.memory_space<vmem>>, %arg9: memref<8x128xf32, #tpu.memory_space<vmem>>, %arg10: memref<8x128xbf16, #tpu.memory_space<vmem>>) attributes {dimension_semantics = [#tpu.dimension_semantics<arbitrary>], iteration_bounds = array<i64: 1>, scalar_prefetch = 0 : i64, scratch_operands = 0 : i64, tpu.core_type = #tpu.core_type<tc>, window_params = [{pipeline_mode = #tpu.pipeline_mode<synchronous>, transform_indices = @transform_0, window_bounds = array<i64: 8, 128>}, {pipeline_mode = #tpu.pipeline_mode<synchronous>, transform_indices = @transform_1, window_bounds = array<i64: 128, 256>}, {pipeline_mode = #tpu.pipeline_mode<synchronous>, transform_indices = @transform_2, window_bounds = array<i64: 1, 256>}, {pipeline_mode = #tpu.pipeline_mode<synchronous>, transform_indices = @transform_3, window_bounds = array<i64: 8, 128>}, {pipeline_mode = #tpu.pipeline_mode<synchronous>, transform_indices = @transform_4, window_bounds = array<i64: 128, 128>}, {pipeline_mode = #tpu.pipeline_mode<synchronous>, transform_indices = @transform_5, window_bounds = array<i64: 1, 128>}, {pipeline_mode = #tpu.pipeline_mode<synchronous>, transform_indices = @transform_6, window_bounds = array<i64: 8, 128>}, {pipeline_mode = #tpu.pipeline_mode<synchronous>, transform_indices = @transform_7, window_bounds = array<i64: 8, 128>}, {pipeline_mode = #tpu.pipeline_mode<synchronous>, transform_indices = @transform_8, window_bounds = array<i64: 8, 128>}, {pipeline_mode = #tpu.pipeline_mode<synchronous>, transform_indices = @transform_9, window_bounds = array<i64: 8, 128>}]} {
    %c0 = arith.constant 0 : index
    %c0_0 = arith.constant 0 : index
    %0 = vector.load %arg1[%c0, %c0_0] : memref<8x128xf32, #tpu.memory_space<vmem>>, vector<8x128xf32>
    %c0_1 = arith.constant 0 : index
    %c0_2 = arith.constant 0 : index
    %1 = vector.load %arg2[%c0_1, %c0_2] : memref<128x256xf32, #tpu.memory_space<vmem>>, vector<128x256xf32>
    %cst = arith.constant dense<0.000000e+00> : vector<8x256xf32>
    %2 = tpu.matmul %0, %1, %cst {dimension_numbers = #tpu.dot_dimension_numbers<[1], [0], [0], [1], [0, 0, 1, 1], [], []>} : vector<8x128xf32>, vector<128x256xf32>, vector<8x256xf32> -> vector<8x256xf32>
    %c0_3 = arith.constant 0 : index
    %c0_4 = arith.constant 0 : index
    %3 = vector.load %arg3[%c0_3, %c0_4] : memref<1x256xf32, #tpu.memory_space<vmem>>, vector<1x256xf32>
    %4 = vector.broadcast %3 : vector<1x256xf32> to vector<8x256xf32>
    %5 = arith.addf %2, %4 : vector<8x256xf32>
    %6 = vector.extract_strided_slice %5 {offsets = [0, 0], sizes = [8, 128], strides = [1, 1]} : vector<8x256xf32> to vector<8x128xf32>
    %7 = vector.extract_strided_slice %5 {offsets = [0, 128], sizes = [8, 128], strides = [1, 1]} : vector<8x256xf32> to vector<8x128xf32>
    %c0_5 = arith.constant 0 : index
    %c0_6 = arith.constant 0 : index
    %8 = vector.load %arg4[%c0_5, %c0_6] : memref<8x128xf32, #tpu.memory_space<vmem>>, vector<8x128xf32>
    %cst_7 = arith.constant 5.000000e-01 : f32
    %9 = vector.broadcast %cst_7 : f32 to vector<8x128xf32>
    %10 = arith.mulf %9, %7 : vector<8x128xf32>
    %11 = math.exp %10 : vector<8x128xf32>
    %12 = arith.mulf %8, %11 : vector<8x128xf32>
    %13 = arith.addf %12, %6 : vector<8x128xf32>
    %c0_8 = arith.constant 0 : index
    %c0_9 = arith.constant 0 : index
    %14 = vector.load %arg5[%c0_8, %c0_9] : memref<128x128xf32, #tpu.memory_space<vmem>>, vector<128x128xf32>
    %cst_10 = arith.constant dense<0.000000e+00> : vector<8x128xf32>
    %15 = tpu.matmul %13, %14, %cst_10 {dimension_numbers = #tpu.dot_dimension_numbers<[1], [0], [0], [1], [0, 0, 1, 1], [], []>} : vector<8x128xf32>, vector<128x128xf32>, vector<8x128xf32> -> vector<8x128xf32>
    %c0_11 = arith.constant 0 : index
    %c0_12 = arith.constant 0 : index
    %16 = vector.load %arg6[%c0_11, %c0_12] : memref<1x128xf32, #tpu.memory_space<vmem>>, vector<1x128xf32>
    %17 = vector.broadcast %16 : vector<1x128xf32> to vector<8x128xf32>
    %18 = arith.addf %15, %17 : vector<8x128xf32>
    %c0_13 = arith.constant 0 : index
    %c0_14 = arith.constant 0 : index
    %19 = vector.load %arg7[%c0_13, %c0_14] : memref<8x128xf32, #tpu.memory_space<vmem>>, vector<8x128xf32>
    tpu.vector_store %arg7[%c0_13, %c0_14], %6 {strides = array<i32>} : memref<8x128xf32, #tpu.memory_space<vmem>>, vector<8x128xf32>,
    %c0_15 = arith.constant 0 : index
    %c0_16 = arith.constant 0 : index
    %20 = vector.load %arg8[%c0_15, %c0_16] : memref<8x128xf32, #tpu.memory_space<vmem>>, vector<8x128xf32>
    tpu.vector_store %arg8[%c0_15, %c0_16], %7 {strides = array<i32>} : memref<8x128xf32, #tpu.memory_space<vmem>>, vector<8x128xf32>,
    %c0_17 = arith.constant 0 : index
    %c0_18 = arith.constant 0 : index
    %21 = vector.load %arg9[%c0_17, %c0_18] : memref<8x128xf32, #tpu.memory_space<vmem>>, vector<8x128xf32>
    tpu.vector_store %arg9[%c0_17, %c0_18], %13 {strides = array<i32>} : memref<8x128xf32, #tpu.memory_space<vmem>>, vector<8x128xf32>,
    %22 = arith.truncf %18 : vector<8x128xf32> to vector<8x128xbf16>
    %c0_19 = arith.constant 0 : index
    %c0_20 = arith.constant 0 : index
    %23 = vector.load %arg10[%c0_19, %c0_20] : memref<8x128xbf16, #tpu.memory_space<vmem>>, vector<8x128xbf16>
    tpu.vector_store %arg10[%c0_19, %c0_20], %22 {strides = array<i32>} : memref<8x128xbf16, #tpu.memory_space<vmem>>, vector<8x128xbf16>,
    return
  }
  func.func @transform_0(%arg0: i32) -> (i32, i32) {
    %c0_i32 = arith.constant 0 : i32
    %c0_i32_0 = arith.constant 0 : i32
    %c0_i32_1 = arith.constant 0 : i32
    return %c0_i32, %c0_i32_0 : i32, i32
  }
  func.func @transform_1(%arg0: i32) -> (i32, i32) {
    %c0_i32 = arith.constant 0 : i32
    %c0_i32_0 = arith.constant 0 : i32
    %c0_i32_1 = arith.constant 0 : i32
    return %c0_i32, %c0_i32_0 : i32, i32
  }
  func.func @transform_2(%arg0: i32) -> (i32, i32) {
    %c0_i32 = arith.constant 0 : i32
    %c0_i32_0 = arith.constant 0 : i32
    %c0_i32_1 = arith.constant 0 : i32
    return %c0_i32, %c0_i32_0 : i32, i32
  }
  func.func @transform_3(%arg0: i32) -> (i32, i32) {
    %c0_i32 = arith.constant 0 : i32
    %c0_i32_0 = arith.constant 0 : i32
    %c0_i32_1 = arith.constant 0 : i32
    return %c0_i32, %c0_i32_0 : i32, i32
  }
  func.func @transform_4(%arg0: i32) -> (i32, i32) {
    %c0_i32 = arith.constant 0 : i32
    %c0_i32_0 = arith.constant 0 : i32
    %c0_i32_1 = arith.constant 0 : i32
    return %c0_i32, %c0_i32_0 : i32, i32
  }
  func.func @transform_5(%arg0: i32) -> (i32, i32) {
    %c0_i32 = arith.constant 0 : i32
    %c0_i32_0 = arith.constant 0 : i32
    %c0_i32_1 = arith.constant 0 : i32
    return %c0_i32, %c0_i32_0 : i32, i32
  }
  func.func @transform_6(%arg0: i32) -> (i32, i32) {
    %c0_i32 = arith.constant 0 : i32
    %c0_i32_0 = arith.constant 0 : i32
    %c0_i32_1 = arith.constant 0 : i32
    return %c0_i32, %c0_i32_0 : i32, i32
  }
  func.func @transform_7(%arg0: i32) -> (i32, i32) {
    %c0_i32 = arith.constant 0 : i32
    %c0_i32_0 = arith.constant 0 : i32
    %c0_i32_1 = arith.constant 0 : i32
    return %c0_i32, %c0_i32_0 : i32, i32
  }
  func.func @transform_8(%arg0: i32) -> (i32, i32) {
    %c0_i32 = arith.constant 0 : i32
    %c0_i32_0 = arith.constant 0 : i32
    %c0_i32_1 = arith.constant 0 : i32
    return %c0_i32, %c0_i32_0 : i32, i32
  }
  func.func @transform_9(%arg0: i32) -> (i32, i32) {
    %c0_i32 = arith.constant 0 : i32
    %c0_i32_0 = arith.constant 0 : i32
    %c0_i32_1 = arith.constant 0 : i32
    return %c0_i32, %c0_i32_0 : i32, i32
  }
}

module attributes {stable_mosaic.version = 11 : i64} {
  func.func @_conv_fused_kernel(%arg0: i32, %arg1: memref<8x128xbf16, #tpu.memory_space<vmem>>, %arg2: memref<128x128xbf16, #tpu.memory_space<vmem>>, %arg3: memref<1x128xf32, #tpu.memory_space<vmem>>, %arg4: memref<1x128xf32, #tpu.memory_space<vmem>>, %arg5: memref<8x128xbf16, #tpu.memory_space<vmem>>) attributes {dimension_semantics = [#tpu.dimension_semantics<arbitrary>], iteration_bounds = array<i64: 1>, scalar_prefetch = 0 : i64, scratch_operands = 0 : i64, tpu.core_type = #tpu.core_type<tc>, window_params = [{pipeline_mode = #tpu.pipeline_mode<synchronous>, transform_indices = @transform_0, window_bounds = array<i64: 8, 128>}, {pipeline_mode = #tpu.pipeline_mode<synchronous>, transform_indices = @transform_1, window_bounds = array<i64: 128, 128>}, {pipeline_mode = #tpu.pipeline_mode<synchronous>, transform_indices = @transform_2, window_bounds = array<i64: 1, 128>}, {pipeline_mode = #tpu.pipeline_mode<synchronous>, transform_indices = @transform_3, window_bounds = array<i64: 1, 128>}, {pipeline_mode = #tpu.pipeline_mode<synchronous>, transform_indices = @transform_4, window_bounds = array<i64: 8, 128>}]} {
    %c0 = arith.constant 0 : index
    %c0_0 = arith.constant 0 : index
    %0 = vector.load %arg1[%c0, %c0_0] : memref<8x128xbf16, #tpu.memory_space<vmem>>, vector<8x128xbf16>
    %c0_1 = arith.constant 0 : index
    %c0_2 = arith.constant 0 : index
    %1 = vector.load %arg2[%c0_1, %c0_2] : memref<128x128xbf16, #tpu.memory_space<vmem>>, vector<128x128xbf16>
    %cst = arith.constant dense<0.000000e+00> : vector<8x128xf32>
    %2 = tpu.matmul %0, %1, %cst {dimension_numbers = #tpu.dot_dimension_numbers<[1], [0], [0], [1], [0, 0, 1, 1], [], []>} : vector<8x128xbf16>, vector<128x128xbf16>, vector<8x128xf32> -> vector<8x128xf32>
    %cst_3 = arith.constant dense<0.000000e+00> : vector<128xf32>
    %3 = vector.multi_reduction <add>, %2, %cst_3 [0] : vector<8x128xf32> to vector<128xf32>
    %4 = vector.shape_cast %3 : vector<128xf32> to vector<1x128xf32>
    %5 = arith.mulf %2, %2 : vector<8x128xf32>
    %cst_4 = arith.constant dense<0.000000e+00> : vector<128xf32>
    %6 = vector.multi_reduction <add>, %5, %cst_4 [0] : vector<8x128xf32> to vector<128xf32>
    %7 = vector.shape_cast %6 : vector<128xf32> to vector<1x128xf32>
    %8 = tpu.concatenate %4, %7 in 0 : vector<1x128xf32>, vector<1x128xf32> -> vector<2x128xf32>
    %c120_i32 = arith.constant 120 : i32
    %9 = tpu.dynamic_rotate %8 by %c120_i32 dim 1 : vector<2x128xf32>, i32 -> vector<2x128xf32>
    %10 = arith.addf %8, %9 : vector<2x128xf32>
    %c112_i32 = arith.constant 112 : i32
    %11 = tpu.dynamic_rotate %8 by %c112_i32 dim 1 : vector<2x128xf32>, i32 -> vector<2x128xf32>
    %12 = arith.addf %10, %11 : vector<2x128xf32>
    %c104_i32 = arith.constant 104 : i32
    %13 = tpu.dynamic_rotate %8 by %c104_i32 dim 1 : vector<2x128xf32>, i32 -> vector<2x128xf32>
    %14 = arith.addf %12, %13 : vector<2x128xf32>
    %15 = tpu.iota {dimensions = array<i32: 1>} : vector<2x128xi32>
    %c8_i32 = arith.constant 8 : i32
    %16 = vector.broadcast %c8_i32 : i32 to vector<2x128xi32>
    %17 = arith.cmpi slt, %15, %16 : vector<2x128xi32>
    %cst_5 = arith.constant 0.000000e+00 : f32
    %18 = vector.broadcast %cst_5 : f32 to vector<2x128xf32>
    %19 = arith.select %17, %14, %18 : vector<2x128xi1>, vector<2x128xf32>
    %c8_i32_6 = arith.constant 8 : i32
    %20 = tpu.dynamic_rotate %19 by %c8_i32_6 dim 1 : vector<2x128xf32>, i32 -> vector<2x128xf32>
    %21 = arith.addf %19, %20 : vector<2x128xf32>
    %c16_i32 = arith.constant 16 : i32
    %22 = tpu.dynamic_rotate %19 by %c16_i32 dim 1 : vector<2x128xf32>, i32 -> vector<2x128xf32>
    %23 = arith.addf %21, %22 : vector<2x128xf32>
    %c24_i32 = arith.constant 24 : i32
    %24 = tpu.dynamic_rotate %19 by %c24_i32 dim 1 : vector<2x128xf32>, i32 -> vector<2x128xf32>
    %25 = arith.addf %23, %24 : vector<2x128xf32>
    %26 = vector.extract_strided_slice %25 {offsets = [0, 0], sizes = [1, 128], strides = [1, 1]} : vector<2x128xf32> to vector<1x128xf32>
    %cst_7 = arith.constant 3.125000e-02 : f32
    %27 = vector.broadcast %cst_7 : f32 to vector<1x128xf32>
    %28 = arith.mulf %26, %27 : vector<1x128xf32>
    %29 = vector.extract_strided_slice %25 {offsets = [1, 0], sizes = [1, 128], strides = [1, 1]} : vector<2x128xf32> to vector<1x128xf32>
    %cst_8 = arith.constant 3.125000e-02 : f32
    %30 = vector.broadcast %cst_8 : f32 to vector<1x128xf32>
    %31 = arith.mulf %29, %30 : vector<1x128xf32>
    %32 = arith.mulf %28, %28 : vector<1x128xf32>
    %33 = arith.subf %31, %32 : vector<1x128xf32>
    %cst_9 = arith.constant 0.000000e+00 : f32
    %34 = vector.broadcast %cst_9 : f32 to vector<1x128xf32>
    %35 = arith.maximumf %33, %34 : vector<1x128xf32>
    %c0_10 = arith.constant 0 : index
    %c0_11 = arith.constant 0 : index
    %36 = vector.load %arg3[%c0_10, %c0_11] : memref<1x128xf32, #tpu.memory_space<vmem>>, vector<1x128xf32>
    %cst_12 = arith.constant 9.99999974E-6 : f32
    %37 = vector.broadcast %cst_12 : f32 to vector<1x128xf32>
    %38 = arith.addf %35, %37 : vector<1x128xf32>
    %39 = math.rsqrt %38 : vector<1x128xf32>
    %40 = arith.mulf %36, %39 : vector<1x128xf32>
    %c0_13 = arith.constant 0 : index
    %c0_14 = arith.constant 0 : index
    %41 = vector.load %arg4[%c0_13, %c0_14] : memref<1x128xf32, #tpu.memory_space<vmem>>, vector<1x128xf32>
    %42 = arith.mulf %28, %40 : vector<1x128xf32>
    %43 = arith.subf %41, %42 : vector<1x128xf32>
    %44 = vector.broadcast %40 : vector<1x128xf32> to vector<8x128xf32>
    %45 = arith.mulf %2, %44 : vector<8x128xf32>
    %46 = vector.broadcast %43 : vector<1x128xf32> to vector<8x128xf32>
    %47 = arith.addf %45, %46 : vector<8x128xf32>
    %cst_15 = arith.constant 0.000000e+00 : f32
    %48 = vector.broadcast %cst_15 : f32 to vector<8x128xf32>
    %49 = arith.cmpf ogt, %47, %48 : vector<8x128xf32>
    %cst_16 = arith.constant 0.00999999977 : f32
    %50 = vector.broadcast %cst_16 : f32 to vector<8x128xf32>
    %51 = arith.mulf %50, %47 : vector<8x128xf32>
    %52 = arith.select %49, %47, %51 : vector<8x128xi1>, vector<8x128xf32>
    %53 = arith.truncf %52 : vector<8x128xf32> to vector<8x128xbf16>
    %c0_17 = arith.constant 0 : index
    %c0_18 = arith.constant 0 : index
    %54 = vector.load %arg5[%c0_17, %c0_18] : memref<8x128xbf16, #tpu.memory_space<vmem>>, vector<8x128xbf16>
    tpu.vector_store %arg5[%c0_17, %c0_18], %53 {strides = array<i32>} : memref<8x128xbf16, #tpu.memory_space<vmem>>, vector<8x128xbf16>,
    return
  }
  func.func @transform_0(%arg0: i32) -> (i32, i32) {
    %c0_i32 = arith.constant 0 : i32
    %c0_i32_0 = arith.constant 0 : i32
    %c0_i32_1 = arith.constant 0 : i32
    return %c0_i32, %c0_i32_0 : i32, i32
  }
  func.func @transform_1(%arg0: i32) -> (i32, i32) {
    %c0_i32 = arith.constant 0 : i32
    %c0_i32_0 = arith.constant 0 : i32
    %c0_i32_1 = arith.constant 0 : i32
    return %c0_i32, %c0_i32_0 : i32, i32
  }
  func.func @transform_2(%arg0: i32) -> (i32, i32) {
    %c0_i32 = arith.constant 0 : i32
    %c0_i32_0 = arith.constant 0 : i32
    %c0_i32_1 = arith.constant 0 : i32
    return %c0_i32, %c0_i32_0 : i32, i32
  }
  func.func @transform_3(%arg0: i32) -> (i32, i32) {
    %c0_i32 = arith.constant 0 : i32
    %c0_i32_0 = arith.constant 0 : i32
    %c0_i32_1 = arith.constant 0 : i32
    return %c0_i32, %c0_i32_0 : i32, i32
  }
  func.func @transform_4(%arg0: i32) -> (i32, i32) {
    %c0_i32 = arith.constant 0 : i32
    %c0_i32_0 = arith.constant 0 : i32
    %c0_i32_1 = arith.constant 0 : i32
    return %c0_i32, %c0_i32_0 : i32, i32
  }
}

module attributes {stable_mosaic.version = 11 : i64} {
  func.func @_conv_fused_kernel(%arg0: i32, %arg1: memref<104x128xbf16, #tpu.memory_space<vmem>>, %arg2: memref<128x128xbf16, #tpu.memory_space<vmem>>, %arg3: memref<1x128xf32, #tpu.memory_space<vmem>>, %arg4: memref<1x128xf32, #tpu.memory_space<vmem>>, %arg5: memref<104x128xbf16, #tpu.memory_space<vmem>>) attributes {dimension_semantics = [#tpu.dimension_semantics<arbitrary>], iteration_bounds = array<i64: 1>, scalar_prefetch = 0 : i64, scratch_operands = 0 : i64, tpu.core_type = #tpu.core_type<tc>, window_params = [{pipeline_mode = #tpu.pipeline_mode<synchronous>, transform_indices = @transform_0, window_bounds = array<i64: 104, 128>}, {pipeline_mode = #tpu.pipeline_mode<synchronous>, transform_indices = @transform_1, window_bounds = array<i64: 128, 128>}, {pipeline_mode = #tpu.pipeline_mode<synchronous>, transform_indices = @transform_2, window_bounds = array<i64: 1, 128>}, {pipeline_mode = #tpu.pipeline_mode<synchronous>, transform_indices = @transform_3, window_bounds = array<i64: 1, 128>}, {pipeline_mode = #tpu.pipeline_mode<synchronous>, transform_indices = @transform_4, window_bounds = array<i64: 104, 128>}]} {
    %c0 = arith.constant 0 : index
    %c0_0 = arith.constant 0 : index
    %0 = vector.load %arg1[%c0, %c0_0] : memref<104x128xbf16, #tpu.memory_space<vmem>>, vector<104x128xbf16>
    %c0_1 = arith.constant 0 : index
    %c0_2 = arith.constant 0 : index
    %1 = vector.load %arg2[%c0_1, %c0_2] : memref<128x128xbf16, #tpu.memory_space<vmem>>, vector<128x128xbf16>
    %cst = arith.constant dense<0.000000e+00> : vector<104x128xf32>
    %2 = tpu.matmul %0, %1, %cst {dimension_numbers = #tpu.dot_dimension_numbers<[1], [0], [0], [1], [0, 0, 1, 1], [], []>} : vector<104x128xbf16>, vector<128x128xbf16>, vector<104x128xf32> -> vector<104x128xf32>
    %cst_3 = arith.constant dense<0.000000e+00> : vector<128xf32>
    %3 = vector.multi_reduction <add>, %2, %cst_3 [0] : vector<104x128xf32> to vector<128xf32>
    %4 = vector.shape_cast %3 : vector<128xf32> to vector<1x128xf32>
    %5 = arith.mulf %2, %2 : vector<104x128xf32>
    %cst_4 = arith.constant dense<0.000000e+00> : vector<128xf32>
    %6 = vector.multi_reduction <add>, %5, %cst_4 [0] : vector<104x128xf32> to vector<128xf32>
    %7 = vector.shape_cast %6 : vector<128xf32> to vector<1x128xf32>
    %8 = tpu.concatenate %4, %7 in 0 : vector<1x128xf32>, vector<1x128xf32> -> vector<2x128xf32>
    %9 = vector.extract_strided_slice %8 {offsets = [0, 0], sizes = [1, 128], strides = [1, 1]} : vector<2x128xf32> to vector<1x128xf32>
    %cst_5 = arith.constant 0.0102040814 : f32
    %10 = vector.broadcast %cst_5 : f32 to vector<1x128xf32>
    %11 = arith.mulf %9, %10 : vector<1x128xf32>
    %12 = vector.extract_strided_slice %8 {offsets = [1, 0], sizes = [1, 128], strides = [1, 1]} : vector<2x128xf32> to vector<1x128xf32>
    %cst_6 = arith.constant 0.0102040814 : f32
    %13 = vector.broadcast %cst_6 : f32 to vector<1x128xf32>
    %14 = arith.mulf %12, %13 : vector<1x128xf32>
    %15 = arith.mulf %11, %11 : vector<1x128xf32>
    %16 = arith.subf %14, %15 : vector<1x128xf32>
    %cst_7 = arith.constant 0.000000e+00 : f32
    %17 = vector.broadcast %cst_7 : f32 to vector<1x128xf32>
    %18 = arith.maximumf %16, %17 : vector<1x128xf32>
    %c0_8 = arith.constant 0 : index
    %c0_9 = arith.constant 0 : index
    %19 = vector.load %arg3[%c0_8, %c0_9] : memref<1x128xf32, #tpu.memory_space<vmem>>, vector<1x128xf32>
    %cst_10 = arith.constant 9.99999974E-6 : f32
    %20 = vector.broadcast %cst_10 : f32 to vector<1x128xf32>
    %21 = arith.addf %18, %20 : vector<1x128xf32>
    %22 = math.rsqrt %21 : vector<1x128xf32>
    %23 = arith.mulf %19, %22 : vector<1x128xf32>
    %c0_11 = arith.constant 0 : index
    %c0_12 = arith.constant 0 : index
    %24 = vector.load %arg4[%c0_11, %c0_12] : memref<1x128xf32, #tpu.memory_space<vmem>>, vector<1x128xf32>
    %25 = arith.mulf %11, %23 : vector<1x128xf32>
    %26 = arith.subf %24, %25 : vector<1x128xf32>
    %27 = vector.broadcast %23 : vector<1x128xf32> to vector<104x128xf32>
    %28 = arith.mulf %2, %27 : vector<104x128xf32>
    %29 = vector.broadcast %26 : vector<1x128xf32> to vector<104x128xf32>
    %30 = arith.addf %28, %29 : vector<104x128xf32>
    %cst_13 = arith.constant 0.000000e+00 : f32
    %31 = vector.broadcast %cst_13 : f32 to vector<104x128xf32>
    %32 = arith.cmpf ogt, %30, %31 : vector<104x128xf32>
    %cst_14 = arith.constant 0.00999999977 : f32
    %33 = vector.broadcast %cst_14 : f32 to vector<104x128xf32>
    %34 = arith.mulf %33, %30 : vector<104x128xf32>
    %35 = arith.select %32, %30, %34 : vector<104x128xi1>, vector<104x128xf32>
    %36 = arith.truncf %35 : vector<104x128xf32> to vector<104x128xbf16>
    %c0_15 = arith.constant 0 : index
    %c0_16 = arith.constant 0 : index
    %37 = vector.load %arg5[%c0_15, %c0_16] : memref<104x128xbf16, #tpu.memory_space<vmem>>, vector<104x128xbf16>
    tpu.vector_store %arg5[%c0_15, %c0_16], %36 {strides = array<i32>} : memref<104x128xbf16, #tpu.memory_space<vmem>>, vector<104x128xbf16>,
    return
  }
  func.func @transform_0(%arg0: i32) -> (i32, i32) {
    %c0_i32 = arith.constant 0 : i32
    %c0_i32_0 = arith.constant 0 : i32
    %c0_i32_1 = arith.constant 0 : i32
    return %c0_i32, %c0_i32_0 : i32, i32
  }
  func.func @transform_1(%arg0: i32) -> (i32, i32) {
    %c0_i32 = arith.constant 0 : i32
    %c0_i32_0 = arith.constant 0 : i32
    %c0_i32_1 = arith.constant 0 : i32
    return %c0_i32, %c0_i32_0 : i32, i32
  }
  func.func @transform_2(%arg0: i32) -> (i32, i32) {
    %c0_i32 = arith.constant 0 : i32
    %c0_i32_0 = arith.constant 0 : i32
    %c0_i32_1 = arith.constant 0 : i32
    return %c0_i32, %c0_i32_0 : i32, i32
  }
  func.func @transform_3(%arg0: i32) -> (i32, i32) {
    %c0_i32 = arith.constant 0 : i32
    %c0_i32_0 = arith.constant 0 : i32
    %c0_i32_1 = arith.constant 0 : i32
    return %c0_i32, %c0_i32_0 : i32, i32
  }
  func.func @transform_4(%arg0: i32) -> (i32, i32) {
    %c0_i32 = arith.constant 0 : i32
    %c0_i32_0 = arith.constant 0 : i32
    %c0_i32_1 = arith.constant 0 : i32
    return %c0_i32, %c0_i32_0 : i32, i32
  }
}

module attributes {stable_mosaic.version = 11 : i64} {
  func.func @_conv_fused_kernel(%arg0: i32, %arg1: memref<32x128xbf16, #tpu.memory_space<vmem>>, %arg2: memref<128x128xbf16, #tpu.memory_space<vmem>>, %arg3: memref<1x128xf32, #tpu.memory_space<vmem>>, %arg4: memref<1x128xf32, #tpu.memory_space<vmem>>, %arg5: memref<32x128xf32, #tpu.memory_space<vmem>>) attributes {dimension_semantics = [#tpu.dimension_semantics<arbitrary>], iteration_bounds = array<i64: 1>, scalar_prefetch = 0 : i64, scratch_operands = 0 : i64, tpu.core_type = #tpu.core_type<tc>, window_params = [{pipeline_mode = #tpu.pipeline_mode<synchronous>, transform_indices = @transform_0, window_bounds = array<i64: 32, 128>}, {pipeline_mode = #tpu.pipeline_mode<synchronous>, transform_indices = @transform_1, window_bounds = array<i64: 128, 128>}, {pipeline_mode = #tpu.pipeline_mode<synchronous>, transform_indices = @transform_2, window_bounds = array<i64: 1, 128>}, {pipeline_mode = #tpu.pipeline_mode<synchronous>, transform_indices = @transform_3, window_bounds = array<i64: 1, 128>}, {pipeline_mode = #tpu.pipeline_mode<synchronous>, transform_indices = @transform_4, window_bounds = array<i64: 32, 128>}]} {
    %c0 = arith.constant 0 : index
    %c0_0 = arith.constant 0 : index
    %0 = vector.load %arg1[%c0, %c0_0] : memref<32x128xbf16, #tpu.memory_space<vmem>>, vector<32x128xbf16>
    %c0_1 = arith.constant 0 : index
    %c0_2 = arith.constant 0 : index
    %1 = vector.load %arg2[%c0_1, %c0_2] : memref<128x128xbf16, #tpu.memory_space<vmem>>, vector<128x128xbf16>
    %cst = arith.constant dense<0.000000e+00> : vector<32x128xf32>
    %2 = tpu.matmul %0, %1, %cst {dimension_numbers = #tpu.dot_dimension_numbers<[1], [0], [0], [1], [0, 0, 1, 1], [], []>} : vector<32x128xbf16>, vector<128x128xbf16>, vector<32x128xf32> -> vector<32x128xf32>
    %c0_3 = arith.constant 0 : index
    %c0_4 = arith.constant 0 : index
    %3 = vector.load %arg4[%c0_3, %c0_4] : memref<1x128xf32, #tpu.memory_space<vmem>>, vector<1x128xf32>
    %4 = vector.broadcast %3 : vector<1x128xf32> to vector<32x128xf32>
    %5 = arith.addf %2, %4 : vector<32x128xf32>
    %6 = math.tanh %5 : vector<32x128xf32>
    %c0_5 = arith.constant 0 : index
    %c0_6 = arith.constant 0 : index
    %7 = vector.load %arg5[%c0_5, %c0_6] : memref<32x128xf32, #tpu.memory_space<vmem>>, vector<32x128xf32>
    tpu.vector_store %arg5[%c0_5, %c0_6], %6 {strides = array<i32>} : memref<32x128xf32, #tpu.memory_space<vmem>>, vector<32x128xf32>,
    return
  }
  func.func @transform_0(%arg0: i32) -> (i32, i32) {
    %c0_i32 = arith.constant 0 : i32
    %c0_i32_0 = arith.constant 0 : i32
    %c0_i32_1 = arith.constant 0 : i32
    return %c0_i32, %c0_i32_0 : i32, i32
  }
  func.func @transform_1(%arg0: i32) -> (i32, i32) {
    %c0_i32 = arith.constant 0 : i32
    %c0_i32_0 = arith.constant 0 : i32
    %c0_i32_1 = arith.constant 0 : i32
    return %c0_i32, %c0_i32_0 : i32, i32
  }
  func.func @transform_2(%arg0: i32) -> (i32, i32) {
    %c0_i32 = arith.constant 0 : i32
    %c0_i32_0 = arith.constant 0 : i32
    %c0_i32_1 = arith.constant 0 : i32
    return %c0_i32, %c0_i32_0 : i32, i32
  }
  func.func @transform_3(%arg0: i32) -> (i32, i32) {
    %c0_i32 = arith.constant 0 : i32
    %c0_i32_0 = arith.constant 0 : i32
    %c0_i32_1 = arith.constant 0 : i32
    return %c0_i32, %c0_i32_0 : i32, i32
  }
  func.func @transform_4(%arg0: i32) -> (i32, i32) {
    %c0_i32 = arith.constant 0 : i32
    %c0_i32_0 = arith.constant 0 : i32
    %c0_i32_1 = arith.constant 0 : i32
    return %c0_i32, %c0_i32_0 : i32, i32
  }
}

</mosaic_0001>

<bundles_post_ra>
// kernel: vae_forward.6
= control target key start
LH: loop header
LB: loop body
LE: loop exit
PB: predicated region body
PF: predicated region fallthrough
CT: control target
= control target key end

     0   :  { %vm138_vm0 = vcmask 1040384   ;;  %s344_s1 = inlined_call_operand.vmem [shape: bf16[128,128], index: 1, kind: input, shape index: {}]   ;;  %s345_s0 = inlined_call_operand.vmem [shape: bf16[32,128], index: 0, kind: input, shape index: {}]   ;;  %s346_s2 = inlined_call_operand.vmem [shape: f32[1,128], index: 2, kind: input, shape index: {}]   ;;  %s347_s3 = inlined_call_operand.vmem [shape: f32[1,128], index: 3, kind: input, shape index: {}]   ;;  %s348_s4 = inlined_call_operand.vmem [shape: bf16[32,128], index: 4, kind: output, shape index: {}]  }
   0x1   :  { %v255_v0 = vld [vmem:[%s344_s1 + $0x38] sm:$0xff]  ;;  %v254_v1 = vld [vmem:[%s344_s1 + $0x30] sm:$0xff]  ;;  %v253_v2 = vld [vmem:[%s344_s1 + $0x28] sm:$0xff] }
   0x2   :  { %97 = vmatpush.bf16.msra.mxu0 %v255_v0  ;;  %267 = vmatpush.bf16.msra.mxu1 %v255_v0  ;;  %v252_v3 = vld [vmem:[%s344_s1 + $0x20] sm:$0xff]  ;;  %v251_v4 = vld [vmem:[%s344_s1 + $0x18] sm:$0xff]  ;;  %v250_v5 = vld [vmem:[%s344_s1 + $0x10] sm:$0xff] }
   0x3   :  { %v249_v6 = vld [vmem:[%s344_s1 + $0x8] sm:$0xff]  ;;  %v248_v7 = vld [vmem:[%s344_s1] sm:$0xff] }
   0x4   :  { %v246_v8 = vld [vmem:[%s345_s0] sm:$0xff]  ;;  %v247_v9 = vld [vmem:[%s345_s0 + $0x8] sm:$0xff] }
   0x5   :  { %v147_v50 = vld [vmem:[%s346_s2] sm:$0x1] }
   0x6   :  { %98 = vmatpush.bf16.msra.mxu0 %v254_v1  ;;  %268 = vmatpush.bf16.msra.mxu1 %v254_v1  ;;  %v165_v53 = vld [vmem:[%s347_s3] sm:$0x1] }
   0xa   :  { %99 = vmatpush.bf16.msra.mxu0 %v253_v2  ;;  %269 = vmatpush.bf16.msra.mxu1 %v253_v2 }
   0xe   :  { %100 = vmatpush.bf16.msra.mxu0 %v252_v3  ;;  %270 = vmatpush.bf16.msra.mxu1 %v252_v3 }
  0x12   :  { %101 = vmatpush.bf16.msra.mxu0 %v251_v4  ;;  %271 = vmatpush.bf16.msra.mxu1 %v251_v4 }
  0x16   :  { %102 = vmatpush.bf16.msra.mxu0 %v250_v5  ;;  %272 = vmatpush.bf16.msra.mxu1 %v250_v5 }
  0x1a   :  { %103 = vmatpush.bf16.msra.mxu0 %v249_v6  ;;  %273 = vmatpush.bf16.msra.mxu1 %v249_v6 }
  0x1e   :  { %104 = vmatpush.bf16.msra.mxu0 %v248_v7  ;;  %274 = vmatpush.bf16.msra.mxu1 %v248_v7 }
  0x21   :  { %105 = vmatmul.bf16.vlgmr.msra.gmra.mxu0 %v246_v8  ;;  %110 = vmatmul.bf16.vlgmr.msra.gmra.mxu1 %v247_v9 }
  0x9e   :  { %v106_v10 = vpop.f32.mrf.mxu0  ;;  %v111_v11 = vpop.f32.mrf.mxu1 }
  0x9f   :  { %v125_v13 = vmul.f32 %v106_v10, %v106_v10  ;;  %v127_v17 = vmul.f32 %v111_v11, %v111_v11 }
  0xa6   :  { %v108_v12 = vpop.f32.mrf.mxu0  ;;  %v113_v16 = vpop.f32.mrf.mxu1 }
  0xa7   :  { %v116_v14 = vadd.f32 %v108_v12, %v106_v10  ;;  %v126_v15 = vmul.f32 %v108_v12, %v108_v12  ;;  %v128_v21 = vmul.f32 %v113_v16, %v113_v16 }
  0xa9   :  { %v129_v18 = vadd.f32 %v126_v15, %v125_v13  ;;  %v117_v19 = vadd.f32 %v116_v14, %v111_v11 }
  0xab   :  { %v118_v20 = vadd.f32 %v117_v19, %v113_v16  ;;  %v130_v22 = vadd.f32 %v129_v18, %v127_v17 }
  0xad   :  { %v119_v23 = vrot.slane %v118_v20, 4  ;;  %v131_v24 = vadd.f32 %v130_v22, %v128_v21 }
  0xaf   :  { %v120_v25 = vadd.f32 %v119_v23, %v118_v20  ;;  %v132_v26 = vrot.slane %v131_v24, 4 }
  0xb1   :  { %v121_v27 = vrot.slane %v120_v25, 2  ;;  %v133_v28 = vadd.f32 %v132_v26, %v131_v24 }
  0xb3   :  { %v122_v29 = vadd.f32 %v121_v27, %v120_v25  ;;  %v134_v30 = vrot.slane %v133_v28, 2 }
  0xb5   :  { %v123_v31 = vrot.slane %v122_v29, 1  ;;  %v135_v32 = vadd.f32 %v134_v30, %v133_v28 }
  0xb7   :  { %v136_v33 = vrot.slane %v135_v32, 1  ;;  %v124_v34 = vadd.f32 %v123_v31, %v122_v29 }
  0xb9   :  { %v137_v35 = vadd.f32 %v136_v33, %v135_v32 }
  0xbb   :  { %v139_v36 = vsel %vm138_vm0, %v124_v34, %v137_v35 }
  0xbc   :  { %v140_v37 = vmul.f32 0.03125, %v139_v36 }
  0xbe   :  { %v141_v38 = vmul.f32 %v140_v37, %v140_v37 }
  0xc0   :  { %v143_v39 = vrot.slane %v141_v38, 7 }
  0xc2   :  { %v145_v40 = vsub.f32 %v140_v37, %v143_v39 }
  0xc4   :  { %v146_v41 = vmax.f32 %v145_v40, 0.0 }
  0xc6   :  { %v148_v42 = vadd.f32 1e-05, %v146_v41 }
  0xc8   :  { %275 = vrsqrt.f32 %v148_v42  ;;  %vm155_vm2 = vweird.f32 %v148_v42 }
  0xce   :  { %v276_v43 = vpop.eup %275 }
  0xcf   :  { %v150_v44 = vmul.f32 %v276_v43, %v148_v42  ;;  %vm156_vm1 = vweird.f32 %v276_v43 }
  0xd0   :  { %vm157_vm3 = vmor %vm155_vm2, %vm156_vm1 }
  0xd1   :  { %v151_v45 = vmul.f32 %v276_v43, %v150_v44 }
  0xd3   :  { %v152_v46 = vmul.f32 0.5, %v151_v45 }
  0xd5   :  { %v153_v47 = vsub.f32 1.5, %v152_v46 }
  0xd7   :  { %v154_v48 = vmul.f32 %v276_v43, %v153_v47 }
  0xd9   :  { %v158_v49 = vsel %vm157_vm3, %v276_v43, %v154_v48 }
  0xda   :  { %160 = vst [vmem:[#allocation1] sm:$0xff] %v158_v49 }
  0xe1   :  { %v162_v51 = vld [vmem:[#allocation1 + $0x1] ss:$9 sm:$0xff] }
  0xe2   :  { %v164_v52 = vmul.f32 %v162_v51, %v147_v50 }
  0xe4   :  { %v166_v54 = vmul.f32 %v164_v52, %v140_v37  ;;  %v169_v55 = vperm.slane %v164_v52, 0 }
  0xe6   :  { %v167_v56 = vsub.f32 %v165_v53, %v166_v54  ;;  %v171_v57 = vmul.f32 %v169_v55, %v106_v10  ;;  %v172_v58 = vmul.f32 %v169_v55, %v108_v12  ;;  %v173_v59 = vmul.f32 %v169_v55, %v111_v11 }
  0xe7   :  { %v174_v60 = vmul.f32 %v169_v55, %v113_v16 }
  0xe8   :  { %v176_v61 = vperm.slane %v167_v56, 0 }
  0xea   :  { %v178_v62 = vadd.f32 %v176_v61, %v171_v57  ;;  %v179_v63 = vadd.f32 %v176_v61, %v172_v58  ;;  %v180_v0 = vadd.f32 %v176_v61, %v173_v59  ;;  %v181_v1 = vadd.f32 %v176_v61, %v174_v60 }
  0xec   :  { %vm182_vm4 = vcmp.gt.f32.partialorder %v178_v62, 0.0  ;;  %vm183_vm5 = vcmp.gt.f32.partialorder %v179_v63, 0.0  ;;  %vm184_vm6 = vcmp.gt.f32.partialorder %v180_v0, 0.0  ;;  %vm185_vm7 = vcmp.gt.f32.partialorder %v181_v1, 0.0 }
  0xed   :  { %v186_v2 = vmul.f32 0.01, %v178_v62  ;;  %v187_v3 = vmul.f32 0.01, %v179_v63  ;;  %v188_v4 = vmul.f32 0.01, %v180_v0 }
  0xee   :  { %v189_v5 = vmul.f32 0.01, %v181_v1 }
  0xef   :  { %v190_v6 = vsel %vm182_vm4, %v178_v62, %v186_v2  ;;  %v191_v7 = vsel %vm183_vm5, %v179_v63, %v187_v3  ;;  %v192_v8 = vsel %vm184_vm6, %v180_v0, %v188_v4 }
  0xf0   :  { %v193_v9 = vsel %vm185_vm7, %v181_v1, %v189_v5  ;;  %v259_v10 = vpack.c.bf16 %v191_v7, %v190_v6 }
  0xf1   :  { %v264_v11 = vpack.c.bf16 %v193_v9, %v192_v8 }
  0xf2   :  { %260 = vst [vmem:[%s348_s4] sm:$0xff] %v259_v10  }
  0xf3   :  { %266 = vst [vmem:[%s348_s4 + $0x8] sm:$0xff] %v264_v11  }

// kernel: vae_forward.7
= control target key start
LH: loop header
LB: loop body
LE: loop exit
PB: predicated region body
PF: predicated region fallthrough
CT: control target
= control target key end

     0   :  { %vm108_vm0 = vcmask 1040384   ;;  %s258_s1 = inlined_call_operand.vmem [shape: bf16[128,128], index: 1, kind: input, shape index: {}]   ;;  %s259_s0 = inlined_call_operand.vmem [shape: bf16[8,128], index: 0, kind: input, shape index: {}]   ;;  %s260_s2 = inlined_call_operand.vmem [shape: f32[1,128], index: 2, kind: input, shape index: {}]   ;;  %s261_s3 = inlined_call_operand.vmem [shape: f32[1,128], index: 3, kind: input, shape index: {}]   ;;  %s262_s4 = inlined_call_operand.vmem [shape: bf16[8,128], index: 4, kind: output, shape index: {}]  }
   0x1   :  { %v194_v0 = vld [vmem:[%s258_s1 + $0x38] sm:$0xff]  ;;  %v193_v1 = vld [vmem:[%s258_s1 + $0x30] sm:$0xff]  ;;  %v192_v2 = vld [vmem:[%s258_s1 + $0x28] sm:$0xff] }
   0x2   :  { %82 = vmatpush.bf16.msra.mxu0 %v194_v0  ;;  %v191_v3 = vld [vmem:[%s258_s1 + $0x20] sm:$0xff]  ;;  %v190_v4 = vld [vmem:[%s258_s1 + $0x18] sm:$0xff]  ;;  %v189_v5 = vld [vmem:[%s258_s1 + $0x10] sm:$0xff] }
   0x3   :  { %v188_v6 = vld [vmem:[%s258_s1 + $0x8] sm:$0xff]  ;;  %v187_v7 = vld [vmem:[%s258_s1] sm:$0xff] }
   0x4   :  { %v17_v8 = vld [vmem:[%s259_s0] sm:$0xf] }
   0x5   :  { %v117_v38 = vld [vmem:[%s260_s2] sm:$0x1] }
   0x6   :  { %83 = vmatpush.bf16.msra.mxu0 %v193_v1  ;;  %v135_v41 = vld [vmem:[%s261_s3] sm:$0x1] }
   0xa   :  { %84 = vmatpush.bf16.msra.mxu0 %v192_v2 }
   0xe   :  { %85 = vmatpush.bf16.msra.mxu0 %v191_v3 }
  0x12   :  { %86 = vmatpush.bf16.msra.mxu0 %v190_v4 }
  0x16   :  { %87 = vmatpush.bf16.msra.mxu0 %v189_v5 }
  0x1a   :  { %88 = vmatpush.bf16.msra.mxu0 %v188_v6 }
  0x1e   :  { %89 = vmatpush.bf16.msra.mxu0 %v187_v7 }
  0x21   :  { %90 = vmatmul.bf16.vlgmr.msra.gmra.mxu0 %v17_v8 }
  0x9e   :  { %v91_v9 = vpop.f32.mrf.mxu0 }
  0x9f   :  { %v95_v10 = vrot.slane %v91_v9, 4  ;;  %v101_v11 = vmul.f32 %v91_v9, %v91_v9 }
  0xa1   :  { %v96_v12 = vadd.f32 %v95_v10, %v91_v9  ;;  %v102_v13 = vrot.slane %v101_v11, 4 }
  0xa3   :  { %v97_v14 = vrot.slane %v96_v12, 2  ;;  %v103_v15 = vadd.f32 %v102_v13, %v101_v11 }
  0xa5   :  { %v98_v16 = vadd.f32 %v97_v14, %v96_v12  ;;  %v104_v17 = vrot.slane %v103_v15, 2 }
  0xa6   :  { %v93_v18 = vpop.f32.mrf.mxu0 }
  0xa7   :  { %v99_v19 = vrot.slane %v98_v16, 1  ;;  %v105_v20 = vadd.f32 %v104_v17, %v103_v15 }
  0xa9   :  { %v106_v21 = vrot.slane %v105_v20, 1  ;;  %v100_v22 = vadd.f32 %v99_v19, %v98_v16 }
  0xab   :  { %v107_v23 = vadd.f32 %v106_v21, %v105_v20 }
  0xad   :  { %v109_v24 = vsel %vm108_vm0, %v100_v22, %v107_v23 }
  0xae   :  { %v110_v25 = vmul.f32 0.125, %v109_v24 }
  0xb0   :  { %v111_v26 = vmul.f32 %v110_v25, %v110_v25 }
  0xb2   :  { %v113_v27 = vrot.slane %v111_v26, 7 }
  0xb4   :  { %v115_v28 = vsub.f32 %v110_v25, %v113_v27 }
  0xb6   :  { %v116_v29 = vmax.f32 %v115_v28, 0.0 }
  0xb8   :  { %v118_v30 = vadd.f32 1e-05, %v116_v29 }
  0xba   :  { %195 = vrsqrt.f32 %v118_v30  ;;  %vm125_vm2 = vweird.f32 %v118_v30 }
  0xc0   :  { %v196_v31 = vpop.eup %195 }
  0xc1   :  { %v120_v32 = vmul.f32 %v196_v31, %v118_v30  ;;  %vm126_vm1 = vweird.f32 %v196_v31 }
  0xc2   :  { %vm127_vm3 = vmor %vm125_vm2, %vm126_vm1 }
  0xc3   :  { %v121_v33 = vmul.f32 %v196_v31, %v120_v32 }
  0xc5   :  { %v122_v34 = vmul.f32 0.5, %v121_v33 }
  0xc7   :  { %v123_v35 = vsub.f32 1.5, %v122_v34 }
  0xc9   :  { %v124_v36 = vmul.f32 %v196_v31, %v123_v35 }
  0xcb   :  { %v128_v37 = vsel %vm127_vm3, %v196_v31, %v124_v36 }
  0xcc   :  { %130 = vst [vmem:[#allocation1] sm:$0xff] %v128_v37 }
  0xd3   :  { %v132_v39 = vld [vmem:[#allocation1 + $0x1] ss:$9 sm:$0xff] }
  0xd4   :  { %v134_v40 = vmul.f32 %v132_v39, %v117_v38 }
  0xd6   :  { %v136_v42 = vmul.f32 %v134_v40, %v110_v25  ;;  %v139_v43 = vperm.slane %v134_v40, 0 }
  0xd8   :  { %v137_v44 = vsub.f32 %v135_v41, %v136_v42  ;;  %v141_v45 = vmul.f32 %v139_v43, %v91_v9 }
  0xda   :  { %v143_v46 = vperm.slane %v137_v44, 0 }
  0xdc   :  { %v145_v47 = vadd.f32 %v143_v46, %v141_v45 }
  0xde   :  { %vm146_vm4 = vcmp.gt.f32.partialorder %v145_v47, 0.0  ;;  %v147_v48 = vmul.f32 0.01, %v145_v47 }
  0xe0   :  { %v148_v49 = vsel %vm146_vm4, %v145_v47, %v147_v48 }
  0xe1   :  { %v149_v50 = vpack.c.bf16 %v148_v49, %v148_v49 }
  0xe3   :  { %150 = vst [vmem:[%s262_s4] sm:$0xf] %v149_v50 }

// kernel: vae_forward.8
= control target key start
LH: loop header
LB: loop body
LE: loop exit
PB: predicated region body
PF: predicated region fallthrough
CT: control target
= control target key end

     0   :  { %s394_s1 = inlined_call_operand.vmem [shape: f32[128,256], index: 1, kind: input, shape index: {}]   ;;  %s395_s4 = inlined_call_operand.vmem [shape: f32[128,128], index: 4, kind: input, shape index: {}]   ;;  %s396_s0 = inlined_call_operand.vmem [shape: f32[8,128], index: 0, kind: input, shape index: {}]   ;;  %s397_s5 = inlined_call_operand.vmem [shape: f32[1,128], index: 5, kind: input, shape index: {}]   ;;  %s398_s2 = inlined_call_operand.vmem [shape: f32[1,256], index: 2, kind: input, shape index: {}]   ;;  %s399_s7 = inlined_call_operand.vmem [shape: f32[8,128], index: 7, kind: output, shape index: {1}]   ;;  %s400_s6 = inlined_call_operand.vmem [shape: f32[8,128], index: 6, kind: output, shape index: {0}]   ;;  %s401_s3 = inlined_call_operand.vmem [shape: f32[8,128], index: 3, kind: input, shape index: {}]   ;;  %s402_s8 = inlined_call_operand.vmem [shape: f32[8,128], index: 8, kind: output, shape index: {2}]   ;;  %s403_s9 = inlined_call_operand.vmem [shape: bf16[8,128], index: 9, kind: output, shape index: {3}]  }
   0x1   :  { %v59_v0 = vld [vmem:[%s394_s1 + $0xf8] sm:$0xff]  ;;  %v57_v1 = vld [vmem:[%s394_s1 + $0xe8] sm:$0xff]  ;;  %v58_v3 = vld [vmem:[%s394_s1 + $0xf0] sm:$0xff] }
   0x2   :  { %86 = vmatpush.msra.mxu1 %v59_v0  ;;  %v55_v2 = vld [vmem:[%s394_s1 + $0xd8] sm:$0xff]  ;;  %66 = vmatpush.msra.mxu0 %v58_v3  ;;  %v56_v4 = vld [vmem:[%s394_s1 + $0xe0] sm:$0xff]  ;;  %v53_v5 = vld [vmem:[%s394_s1 + $0xc8] sm:$0xff] }
   0x3   :  { %v54_v6 = vld [vmem:[%s394_s1 + $0xd0] sm:$0xff]  ;;  %v51_v7 = vld [vmem:[%s394_s1 + $0xb8] sm:$0xff]  ;;  %v52_v8 = vld [vmem:[%s394_s1 + $0xc0] sm:$0xff] }
   0x4   :  { %87 = vmatpush.msra.mxu1 %v57_v1  ;;  %67 = vmatpush.msra.mxu0 %v56_v4  ;;  %v49_v9 = vld [vmem:[%s394_s1 + $0xa8] sm:$0xff]  ;;  %v50_v10 = vld [vmem:[%s394_s1 + $0xb0] sm:$0xff]  ;;  %v47_v11 = vld [vmem:[%s394_s1 + $0x98] sm:$0xff] }
   0x5   :  { %v48_v12 = vld [vmem:[%s394_s1 + $0xa0] sm:$0xff]  ;;  %v127_v13 = vld [vmem:[%s395_s4 + $0x78] sm:$0xff]  ;;  %v126_v14 = vld [vmem:[%s395_s4 + $0x70] sm:$0xff] }
   0x6   :  { %88 = vmatpush.msra.mxu1 %v55_v2  ;;  %68 = vmatpush.msra.mxu0 %v54_v6  ;;  %v45_v15 = vld [vmem:[%s394_s1 + $0x88] sm:$0xff]  ;;  %v46_v16 = vld [vmem:[%s394_s1 + $0x90] sm:$0xff]  ;;  %v43_v18 = vld [vmem:[%s394_s1 + $0x78] sm:$0xff] }
   0x7   :  { %132 = vmatpush.msra.mxu2 %v127_v13  ;;  %v125_v17 = vld [vmem:[%s395_s4 + $0x68] sm:$0xff]  ;;  %v44_v19 = vld [vmem:[%s394_s1 + $0x80] sm:$0xff]  ;;  %v42_v22 = vld [vmem:[%s394_s1 + $0x70] sm:$0xff] }
   0x8   :  { %89 = vmatpush.msra.mxu1 %v53_v5  ;;  %69 = vmatpush.msra.mxu0 %v52_v8  ;;  %v124_v20 = vld [vmem:[%s395_s4 + $0x60] sm:$0xff]  ;;  %v41_v21 = vld [vmem:[%s394_s1 + $0x68] sm:$0xff]  ;;  %v123_v23 = vld [vmem:[%s395_s4 + $0x58] sm:$0xff] }
   0x9   :  { %133 = vmatpush.msra.mxu2 %v126_v14  ;;  %v39_v24 = vld [vmem:[%s394_s1 + $0x58] sm:$0xff]  ;;  %v40_v25 = vld [vmem:[%s394_s1 + $0x60] sm:$0xff]  ;;  %v122_v26 = vld [vmem:[%s395_s4 + $0x50] sm:$0xff] }
   0xa   :  { %90 = vmatpush.msra.mxu1 %v51_v7  ;;  %70 = vmatpush.msra.mxu0 %v50_v10  ;;  %v37_v27 = vld [vmem:[%s394_s1 + $0x48] sm:$0xff]  ;;  %v38_v28 = vld [vmem:[%s394_s1 + $0x50] sm:$0xff]  ;;  %v35_v30 = vld [vmem:[%s394_s1 + $0x38] sm:$0xff] }
   0xb   :  { %134 = vmatpush.msra.mxu2 %v125_v17  ;;  %v121_v29 = vld [vmem:[%s395_s4 + $0x48] sm:$0xff]  ;;  %v36_v31 = vld [vmem:[%s394_s1 + $0x40] sm:$0xff]  ;;  %v34_v33 = vld [vmem:[%s394_s1 + $0x30] sm:$0xff] }
   0xc   :  { %91 = vmatpush.msra.mxu1 %v49_v9  ;;  %71 = vmatpush.msra.mxu0 %v48_v12  ;;  %v33_v32 = vld [vmem:[%s394_s1 + $0x28] sm:$0xff]  ;;  %v31_v34 = vld [vmem:[%s394_s1 + $0x18] sm:$0xff]  ;;  %v32_v35 = vld [vmem:[%s394_s1 + $0x20] sm:$0xff] }
   0xd   :  { %135 = vmatpush.msra.mxu2 %v124_v20  ;;  %v29_v36 = vld [vmem:[%s394_s1 + $0x8] sm:$0xff]  ;;  %v30_v37 = vld [vmem:[%s394_s1 + $0x10] sm:$0xff]  ;;  %v27_v38 = vld [vmem:[%s396_s0] sm:$0xff] }
   0xe   :  { %92 = vmatpush.msra.mxu1 %v47_v11  ;;  %72 = vmatpush.msra.mxu0 %v46_v16  ;;  %v28_v39 = vld [vmem:[%s394_s1] sm:$0xff]  ;;  %v119_v41 = vld [vmem:[%s395_s4 + $0x38] sm:$0xff]  ;;  %v118_v42 = vld [vmem:[%s395_s4 + $0x30] sm:$0xff] }
   0xf   :  { %136 = vmatpush.msra.mxu2 %v123_v23  ;;  %v120_v40 = vld [vmem:[%s395_s4 + $0x40] sm:$0xff]  ;;  %v117_v43 = vld [vmem:[%s395_s4 + $0x28] sm:$0xff]  ;;  %v115_v45 = vld [vmem:[%s395_s4 + $0x18] sm:$0xff] }
  0x10   :  { %93 = vmatpush.msra.mxu1 %v45_v15  ;;  %73 = vmatpush.msra.mxu0 %v44_v19  ;;  %v116_v44 = vld [vmem:[%s395_s4 + $0x20] sm:$0xff]  ;;  %v114_v46 = vld [vmem:[%s395_s4 + $0x10] sm:$0xff]  ;;  %v113_v47 = vld [vmem:[%s395_s4 + $0x8] sm:$0xff] }
  0x11   :  { %137 = vmatpush.msra.mxu2 %v122_v26  ;;  %v112_v48 = vld [vmem:[%s395_s4] sm:$0xff] }
  0x12   :  { %94 = vmatpush.msra.mxu1 %v43_v18  ;;  %74 = vmatpush.msra.mxu0 %v42_v22  ;;  %v60_v49 = vld [vmem:[%s398_s2] sm:$0x3] }
  0x13   :  { %138 = vmatpush.msra.mxu2 %v121_v29  ;;  %v63_v50 = vperm.slane %v60_v49, 1  ;;  %v62_v51 = vperm.slane %v60_v49, 0  ;;  %v106_v58 = vld [vmem:[%s401_s3] sm:$0xff] }
  0x14   :  { %95 = vmatpush.msra.mxu1 %v41_v21  ;;  %75 = vmatpush.msra.mxu0 %v40_v25  ;;  %v173_v62 = vld [vmem:[%s397_s5] ss:$0 sm:$0xff] }
  0x15   :  { %139 = vmatpush.msra.mxu2 %v120_v40 }
  0x16   :  { %96 = vmatpush.msra.mxu1 %v39_v24  ;;  %76 = vmatpush.msra.mxu0 %v38_v28 }
  0x17   :  { %140 = vmatpush.msra.mxu2 %v119_v41 }
  0x18   :  { %97 = vmatpush.msra.mxu1 %v37_v27  ;;  %77 = vmatpush.msra.mxu0 %v36_v31 }
  0x19   :  { %141 = vmatpush.msra.mxu2 %v118_v42 }
  0x1a   :  { %98 = vmatpush.msra.mxu1 %v35_v30  ;;  %78 = vmatpush.msra.mxu0 %v34_v33 }
  0x1b   :  { %142 = vmatpush.msra.mxu2 %v117_v43 }
  0x1c   :  { %99 = vmatpush.msra.mxu1 %v33_v32  ;;  %79 = vmatpush.msra.mxu0 %v32_v35 }
  0x1d   :  { %143 = vmatpush.msra.mxu2 %v116_v44 }
  0x1e   :  { %100 = vmatpush.msra.mxu1 %v31_v34  ;;  %80 = vmatpush.msra.mxu0 %v30_v37 }
  0x1f   :  { %144 = vmatpush.msra.mxu2 %v115_v45 }
  0x20   :  { %101 = vmatpush.msra.mxu1 %v29_v36  ;;  %81 = vmatpush.msra.mxu0 %v28_v39 }
  0x21   :  { %102 = vmatmul.f32.vlgmr.msra.gmra.mxu1 %v27_v38  ;;  %82 = vmatmul.f32.vlgmr.msra.gmra.mxu0 %v27_v38 }
  0x22   :  { %145 = vmatpush.msra.mxu2 %v114_v46 }
  0x24   :  { %146 = vmatpush.msra.mxu2 %v113_v47 }
  0x26   :  { %147 = vmatpush.msra.mxu2 %v112_v48 }
  0x9e   :  { %v103_v52 = vpop.f32.mrf.mxu1  ;;  %v83_v54 = vpop.f32.mrf.mxu0 }
  0x9f   :  { %v104_v53 = vadd.f32 %v103_v52, %v63_v50  ;;  %v84_v56 = vadd.f32 %v83_v54, %v62_v51 }
  0xa1   :  { %v107_v55 = vmul.f32 0.5, %v104_v53  ;;  %153 = vst [vmem:[%s399_s7] sm:$0xff] %v104_v53 }
  0xa2   :  { %152 = vst [vmem:[%s400_s6] sm:$0xff] %v84_v56 }
  0xa3   :  { %v108_v57 = vmul.f32 1.442695, %v107_v55 }
  0xa5   :  { %174 = vpow2.f32 %v108_v57 }
  0xab   :  { %v175_v59 = vpop.eup %174 }
  0xac   :  { %v110_v60 = vmul.f32 %v175_v59, %v106_v58 }
  0xae   :  { %v111_v61 = vadd.f32 %v110_v60, %v84_v56 }
  0xb0   :  { %148 = vmatmul.f32.vlgmr.msra.gmra.mxu2 %v111_v61  ;;  %154 = vst [vmem:[%s402_s8] sm:$0xff] %v111_v61 }
 0x133   :  { %v149_v63 = vpop.f32.mrf.mxu2 }
 0x134   :  { %v150_v0 = vadd.f32 %v173_v62, %v149_v63 }
 0x136   :  { %v155_v1 = vpack.c.bf16 %v150_v0, %v150_v0 }
 0x138   :  { %156 = vst [vmem:[%s403_s9] sm:$0xf] %v155_v1 }

// kernel: tile.13
= control target key start
LH: loop header
LB: loop body
LE: loop exit
PB: predicated region body
PF: predicated region fallthrough
CT: control target
= control target key end

     0   :  { %s22_s0 = inlined_call_operand.vmem [shape: f32[8], index: 0, kind: input, shape index: {}]   ;;  %s23_s1 = inlined_call_operand.vmem [shape: f32[4,8], index: 1, kind: output, shape index: {}]  }
   0x1   :  { %v4_v0 = vld [vmem:[%s22_s0] ss:$0 sm:$0xff] }
   0x2   :  { %5 = vst [vmem:[%s23_s1] sm:$0xf] %v4_v0 }

// kernel: tile.14
= control target key start
LH: loop header
LB: loop body
LE: loop exit
PB: predicated region body
PF: predicated region fallthrough
CT: control target
= control target key end

     0   :  { %s37_s8 = smov 8   ;;  %s38_s9 = smov 16   ;;  %vm7_vm0 = vcmask 64512   ;;  %vm13_vm1 = vcmask 261312   ;;  %vm19_vm2 = vcmask 195712   ;;  %vm25_vm3 = vcmask 130112   ;;  %s55_s0 = inlined_call_operand.vmem [shape: f32[4,8], index: 0, kind: input, shape index: {}]   ;;  %s56_s1 = inlined_call_operand.vmem [shape: f32[32], index: 1, kind: output, shape index: {}]  }
   0x1   :  { %v4_v0 = vld [vmem:[%s55_s0] sm:$0xf]  ;;  %s36_s0 = smov 24  }
   0x2   :  { %5 = vst [vmem:[#allocation1] sm:$0xf] %v4_v0 }
   0x9   :  { %v10_v1 = vld [vmem:[#allocation1 + $0x3] sm:$0x1]   ;;  %v22_v2 = vld [vmem:[#allocation1 + $0x1] sm:$0x1]   ;;  %v16_v3 = vld [vmem:[#allocation1 + $0x2] sm:$0x1]  }
   0xa   :  { %11 = vrot.lane.b32.xlu0 %v10_v1, %s36_s0  ;;  %23 = vrot.lane.b32.xlu1 %v22_v2, %s37_s8  ;;  %v6_v4 = vld [vmem:[#allocation1] sm:$0x1]  }
   0xb   :  { %8 = vst.msk [vmem:[#allocation0] sm:$0x1] %vm7_vm0, %v6_v4  }
  0x12   :  { %17 = vrot.lane.b32.xlu0 %v16_v3, %s38_s9 }
  0x7c   :  { %v12_v5 = vpop.permute.xlu0 %11   ;;  %v24_v6 = vpop.permute.xlu1 %23  }
  0x7d   :  { %14 = vst.msk [vmem:[#allocation0] sm:$0x1] %vm13_vm1, %v12_v5  }
  0x84   :  { %v18_v7 = vpop.permute.xlu0 %17  }
  0x85   :  { %20 = vst.msk [vmem:[#allocation0] sm:$0x1] %vm19_vm2, %v18_v7  }
  0x86   :  { %26 = vst.msk [vmem:[#allocation0] sm:$0x1] %vm25_vm3, %v24_v6  }
  0x8d   :  { %v29_v8 = vld [vmem:[#allocation0] sm:$0x1] }
  0x8e   :  { %32 = vst [vmem:[%s56_s1] sm:$0x1] %v29_v8 }

// kernel: vae_forward.9
= control target key start
LH: loop header
LB: loop body
LE: loop exit
PB: predicated region body
PF: predicated region fallthrough
CT: control target
= control target key end

     0   :  { %vm108_vm0 = vcmask 1040384   ;;  %s227_s7 = smov 112   ;;  %v119_v26 = vlaneseq  ;;  %s228_s8 = smov 16   ;;  %s299_s1 = inlined_call_operand.vmem [shape: bf16[128,128], index: 1, kind: input, shape index: {}]   ;;  %s300_s0 = inlined_call_operand.vmem [shape: bf16[8,128], index: 0, kind: input, shape index: {}]   ;;  %s301_s2 = inlined_call_operand.vmem [shape: f32[1,128], index: 2, kind: input, shape index: {}]   ;;  %s302_s3 = inlined_call_operand.vmem [shape: f32[1,128], index: 3, kind: input, shape index: {}]   ;;  %s303_s4 = inlined_call_operand.vmem [shape: bf16[8,128], index: 4, kind: output, shape index: {}]  }
   0x1   :  { %v216_v0 = vld [vmem:[%s299_s1 + $0x38] sm:$0xff]  ;;  %v215_v1 = vld [vmem:[%s299_s1 + $0x30] sm:$0xff]  ;;  %v214_v2 = vld [vmem:[%s299_s1 + $0x28] sm:$0xff]  ;;  %s229_s9 = smov 8   ;;  %s230_s10 = smov 24  }
   0x2   :  { %82 = vmatpush.bf16.msra.mxu0 %v216_v0  ;;  %v213_v3 = vld [vmem:[%s299_s1 + $0x20] sm:$0xff]  ;;  %v212_v4 = vld [vmem:[%s299_s1 + $0x18] sm:$0xff]  ;;  %v211_v5 = vld [vmem:[%s299_s1 + $0x10] sm:$0xff]  ;;  %v120_v27 = vand.u32 127, %v119_v26 }
   0x3   :  { %v210_v6 = vld [vmem:[%s299_s1 + $0x8] sm:$0xff]  ;;  %v209_v7 = vld [vmem:[%s299_s1] sm:$0xff]  ;;  %s226_s1 = smov 120  }
   0x4   :  { %v17_v8 = vld [vmem:[%s300_s0] sm:$0xf]  ;;  %s225_s0 = smov 104   ;;  %vm121_vm1 = vcmp.lt.s32.totalorder %v120_v27, 8 }
   0x5   :  { %v139_v53 = vld [vmem:[%s301_s2] sm:$0x1] }
   0x6   :  { %83 = vmatpush.bf16.msra.mxu0 %v215_v1  ;;  %v157_v56 = vld [vmem:[%s302_s3] sm:$0x1] }
   0xa   :  { %84 = vmatpush.bf16.msra.mxu0 %v214_v2 }
   0xe   :  { %85 = vmatpush.bf16.msra.mxu0 %v213_v3 }
  0x12   :  { %86 = vmatpush.bf16.msra.mxu0 %v212_v4 }
  0x16   :  { %87 = vmatpush.bf16.msra.mxu0 %v211_v5 }
  0x1a   :  { %88 = vmatpush.bf16.msra.mxu0 %v210_v6 }
  0x1e   :  { %89 = vmatpush.bf16.msra.mxu0 %v209_v7 }
  0x21   :  { %90 = vmatmul.bf16.vlgmr.msra.gmra.mxu0 %v17_v8 }
  0x9e   :  { %v283_v9 = vpop.f32.mrf.mxu0 }
  0x9f   :  { %v95_v10 = vrot.slane %v283_v9, 4  ;;  %v101_v11 = vmul.f32 %v283_v9, %v283_v9 }
  0xa1   :  { %v96_v12 = vadd.f32 %v95_v10, %v283_v9  ;;  %v102_v13 = vrot.slane %v101_v11, 4 }
  0xa3   :  { %v97_v14 = vrot.slane %v96_v12, 2  ;;  %v103_v15 = vadd.f32 %v102_v13, %v101_v11 }
  0xa5   :  { %v98_v16 = vadd.f32 %v97_v14, %v96_v12  ;;  %v104_v17 = vrot.slane %v103_v15, 2 }
  0xa6   :  { %v93_v18 = vpop.f32.mrf.mxu0 }
  0xa7   :  { %v99_v19 = vrot.slane %v98_v16, 1  ;;  %v105_v20 = vadd.f32 %v104_v17, %v103_v15 }
  0xa9   :  { %v106_v21 = vrot.slane %v105_v20, 1  ;;  %v100_v22 = vadd.f32 %v99_v19, %v98_v16 }
  0xab   :  { %v107_v23 = vadd.f32 %v106_v21, %v105_v20 }
  0xad   :  { %v109_v24 = vsel %vm108_vm0, %v100_v22, %v107_v23 }
  0xae   :  { %116 = vrot.lane.b32.xlu1 %v109_v24, %s225_s0  ;;  %110 = vrot.lane.b32.xlu0 %v109_v24, %s226_s1 }
  0xb6   :  { %113 = vrot.lane.b32.xlu0 %v109_v24, %s227_s7 }
 0x120   :  { %v111_v25 = vpop.permute.xlu0 %110  ;;  %v117_v31 = vpop.permute.xlu1 %116 }
 0x121   :  { %v112_v28 = vadd.f32 %v111_v25, %v109_v24 }
 0x128   :  { %v114_v29 = vpop.permute.xlu0 %113 }
 0x129   :  { %v115_v30 = vadd.f32 %v114_v29, %v112_v28 }
 0x12b   :  { %v118_v32 = vadd.f32 %v117_v31, %v115_v30 }
 0x12d   :  { %v122_v33 = vsel %vm121_vm1, %v118_v32, 0.0 }
 0x12e   :  { %126 = vrot.lane.b32.xlu2 %v122_v33, %s228_s8  ;;  %123 = vrot.lane.b32.xlu1 %v122_v33, %s229_s9 }
 0x136   :  { %129 = vrot.lane.b32.xlu2 %v122_v33, %s230_s10 }
 0x188   :  { %v127_v34 = vpop.permute.xlu2 %126 }
 0x190   :  { %v130_v38 = vpop.permute.xlu2 %129 }
 0x1a0   :  { %v124_v35 = vpop.permute.xlu1 %123 }
 0x1a1   :  { %v125_v36 = vadd.f32 %v124_v35, %v122_v33 }
 0x1a3   :  { %v128_v37 = vadd.f32 %v127_v34, %v125_v36 }
 0x1a5   :  { %v131_v39 = vadd.f32 %v130_v38, %v128_v37 }
 0x1a7   :  { %v132_v40 = vmul.f32 0.03125, %v131_v39 }
 0x1a9   :  { %v133_v41 = vmul.f32 %v132_v40, %v132_v40 }
 0x1ab   :  { %v135_v42 = vrot.slane %v133_v41, 7 }
 0x1ad   :  { %v137_v43 = vsub.f32 %v132_v40, %v135_v42 }
 0x1af   :  { %v138_v44 = vmax.f32 %v137_v43, 0.0 }
 0x1b1   :  { %v140_v45 = vadd.f32 1e-05, %v138_v44 }
 0x1b3   :  { %223 = vrsqrt.f32 %v140_v45  ;;  %vm147_vm3 = vweird.f32 %v140_v45 }
 0x1b9   :  { %v224_v46 = vpop.eup %223 }
 0x1ba   :  { %v142_v47 = vmul.f32 %v224_v46, %v140_v45  ;;  %vm148_vm2 = vweird.f32 %v224_v46 }
 0x1bb   :  { %vm149_vm4 = vmor %vm147_vm3, %vm148_vm2 }
 0x1bc   :  { %v143_v48 = vmul.f32 %v224_v46, %v142_v47 }
 0x1be   :  { %v144_v49 = vmul.f32 0.5, %v143_v48 }
 0x1c0   :  { %v145_v50 = vsub.f32 1.5, %v144_v49 }
 0x1c2   :  { %v146_v51 = vmul.f32 %v224_v46, %v145_v50 }
 0x1c4   :  { %v150_v52 = vsel %vm149_vm4, %v224_v46, %v146_v51 }
 0x1c5   :  { %152 = vst [vmem:[#allocation1] sm:$0xff] %v150_v52 }
 0x1cc   :  { %v154_v54 = vld [vmem:[#allocation1 + $0x1] ss:$9 sm:$0xff] }
 0x1cd   :  { %v156_v55 = vmul.f32 %v154_v54, %v139_v53 }
 0x1cf   :  { %v158_v57 = vmul.f32 %v156_v55, %v132_v40  ;;  %v161_v58 = vperm.slane %v156_v55, 0 }
 0x1d1   :  { %v159_v59 = vsub.f32 %v157_v56, %v158_v57  ;;  %v163_v60 = vmul.f32 %v161_v58, %v283_v9 }
 0x1d3   :  { %v165_v61 = vperm.slane %v159_v59, 0 }
 0x1d5   :  { %v167_v62 = vadd.f32 %v165_v61, %v163_v60 }
 0x1d7   :  { %vm168_vm5 = vcmp.gt.f32.partialorder %v167_v62, 0.0  ;;  %v169_v63 = vmul.f32 0.01, %v167_v62 }
 0x1d9   :  { %v170_v0 = vsel %vm168_vm5, %v167_v62, %v169_v63 }
 0x1da   :  { %v171_v1 = vpack.c.bf16 %v170_v0, %v170_v0 }
 0x1dc   :  { %172 = vst [vmem:[%s303_s4] sm:$0xf] %v171_v1 }

// kernel: vae_forward.10
= control target key start
LH: loop header
LB: loop body
LE: loop exit
PB: predicated region body
PF: predicated region fallthrough
CT: control target
= control target key end

     0   :  { %vm226_vm0 = vcmask 1040384   ;;  %s676_s1 = inlined_call_operand.vmem [shape: bf16[128,128], index: 1, kind: input, shape index: {}]   ;;  %s677_s0 = inlined_call_operand.vmem [shape: bf16[104,128], index: 0, kind: input, shape index: {}]   ;;  %s678_s2 = inlined_call_operand.vmem [shape: f32[1,128], index: 2, kind: input, shape index: {}]   ;;  %s679_s3 = inlined_call_operand.vmem [shape: f32[1,128], index: 3, kind: input, shape index: {}]   ;;  %s680_s4 = inlined_call_operand.vmem [shape: bf16[104,128], index: 4, kind: output, shape index: {}]  }
   0x1   :  { %v426_v0 = vld [vmem:[%s676_s1 + $0x38] sm:$0xff]  ;;  %v425_v1 = vld [vmem:[%s676_s1 + $0x30] sm:$0xff]  ;;  %v424_v2 = vld [vmem:[%s676_s1 + $0x28] sm:$0xff] }
   0x2   :  { %134 = vmatpush.bf16.msra.mxu0 %v426_v0  ;;  %462 = vmatpush.bf16.msra.mxu1 %v426_v0  ;;  %v423_v3 = vld [vmem:[%s676_s1 + $0x20] sm:$0xff]  ;;  %v422_v4 = vld [vmem:[%s676_s1 + $0x18] sm:$0xff]  ;;  %v421_v5 = vld [vmem:[%s676_s1 + $0x10] sm:$0xff] }
   0x3   :  { %463 = vmatpush.bf16.msra.mxu2 %v426_v0  ;;  %464 = vmatpush.bf16.msra.mxu3 %v426_v0  ;;  %v420_v6 = vld [vmem:[%s676_s1 + $0x8] sm:$0xff]  ;;  %v419_v7 = vld [vmem:[%s676_s1] sm:$0xff]  ;;  %v416_v10 = vld [vmem:[%s677_s0 + $0x18] sm:$0xff] }
   0x4   :  { %v413_v8 = vld [vmem:[%s677_s0] sm:$0xff]  ;;  %v414_v9 = vld [vmem:[%s677_s0 + $0x8] sm:$0xff]  ;;  %v29_v12 = vld [vmem:[%s677_s0 + $0x30] sm:$0xf] }
   0x5   :  { %v418_v11 = vld [vmem:[%s677_s0 + $0x28] sm:$0xff]  ;;  %v71_v13 = vunpack.c.l.b16 %v29_v12  ;;  %v415_v14 = vld [vmem:[%s677_s0 + $0x10] sm:$0xff]  ;;  %v417_v15 = vld [vmem:[%s677_s0 + $0x20] sm:$0xff] }
   0x6   :  { %135 = vmatpush.bf16.msra.mxu0 %v425_v1  ;;  %465 = vmatpush.bf16.msra.mxu1 %v425_v1 }
   0x7   :  { %466 = vmatpush.bf16.msra.mxu2 %v425_v1  ;;  %467 = vmatpush.bf16.msra.mxu3 %v425_v1  ;;  %v78_v16 = vpack.c.b16 %v71_v13, %v71_v13 }
   0xa   :  { %136 = vmatpush.bf16.msra.mxu0 %v424_v2  ;;  %468 = vmatpush.bf16.msra.mxu1 %v424_v2 }
   0xb   :  { %469 = vmatpush.bf16.msra.mxu2 %v424_v2  ;;  %470 = vmatpush.bf16.msra.mxu3 %v424_v2 }
   0xe   :  { %137 = vmatpush.bf16.msra.mxu0 %v423_v3  ;;  %471 = vmatpush.bf16.msra.mxu1 %v423_v3 }
   0xf   :  { %472 = vmatpush.bf16.msra.mxu2 %v423_v3  ;;  %473 = vmatpush.bf16.msra.mxu3 %v423_v3 }
  0x12   :  { %138 = vmatpush.bf16.msra.mxu0 %v422_v4  ;;  %474 = vmatpush.bf16.msra.mxu1 %v422_v4 }
  0x13   :  { %475 = vmatpush.bf16.msra.mxu2 %v422_v4  ;;  %476 = vmatpush.bf16.msra.mxu3 %v422_v4 }
  0x16   :  { %139 = vmatpush.bf16.msra.mxu0 %v421_v5  ;;  %477 = vmatpush.bf16.msra.mxu1 %v421_v5 }
  0x17   :  { %478 = vmatpush.bf16.msra.mxu2 %v421_v5  ;;  %479 = vmatpush.bf16.msra.mxu3 %v421_v5 }
  0x1a   :  { %140 = vmatpush.bf16.msra.mxu0 %v420_v6  ;;  %480 = vmatpush.bf16.msra.mxu1 %v420_v6 }
  0x1b   :  { %481 = vmatpush.bf16.msra.mxu2 %v420_v6  ;;  %482 = vmatpush.bf16.msra.mxu3 %v420_v6 }
  0x1e   :  { %141 = vmatpush.bf16.msra.mxu0 %v419_v7  ;;  %483 = vmatpush.bf16.msra.mxu1 %v419_v7 }
  0x1f   :  { %484 = vmatpush.bf16.msra.mxu2 %v419_v7  ;;  %485 = vmatpush.bf16.msra.mxu3 %v419_v7 }
  0x21   :  { %142 = vmatmul.bf16.vlgmr.msra.gmra.mxu0 %v413_v8  ;;  %147 = vmatmul.bf16.vlgmr.msra.gmra.mxu1 %v414_v9 }
  0x22   :  { %157 = vmatmul.bf16.vlgmr.msra.gmra.mxu2 %v416_v10  ;;  %167 = vmatmul.bf16.vlgmr.msra.gmra.mxu3 %v418_v11 }
  0x31   :  { %152 = vmatmul.bf16.gmra.mxu1 %v415_v14 }
  0x32   :  { %162 = vmatmul.bf16.gmra.mxu2 %v417_v15  ;;  %172 = vmatmul.bf16.gmra.mxu3 %v78_v16 }
  0x9e   :  { %v558_v17 = vpop.f32.mrf.mxu0  ;;  %v560_v18 = vpop.f32.mrf.mxu1 }
  0x9f   :  { %v195_v23 = vmul.f32 %v558_v17, %v558_v17  ;;  %v197_v30 = vmul.f32 %v560_v18, %v560_v18 }
  0xa5   :  { %v562_v19 = vpop.f32.mrf.mxu2  ;;  %v564_v20 = vpop.f32.mrf.mxu3 }
  0xa6   :  { %v566_v21 = vpop.f32.mrf.mxu0  ;;  %v568_v22 = vpop.f32.mrf.mxu1  ;;  %v201_v44 = vmul.f32 %v562_v19, %v562_v19  ;;  %v205_v58 = vmul.f32 %v564_v20, %v564_v20 }
  0xa7   :  { %v196_v24 = vmul.f32 %v566_v21, %v566_v21  ;;  %v177_v25 = vadd.f32 %v566_v21, %v558_v17  ;;  %v198_v34 = vmul.f32 %v568_v22, %v568_v22 }
  0xa9   :  { %v208_v26 = vadd.f32 %v196_v24, %v195_v23  ;;  %v178_v31 = vadd.f32 %v177_v25, %v560_v18 }
  0xab   :  { %v209_v32 = vadd.f32 %v208_v26, %v197_v30  ;;  %v179_v33 = vadd.f32 %v178_v31, %v568_v22 }
  0xad   :  { %v576_v27 = vpop.f32.mrf.mxu2  ;;  %v578_v28 = vpop.f32.mrf.mxu3  ;;  %v210_v36 = vadd.f32 %v209_v32, %v198_v34 }
  0xae   :  { %v580_v29 = vpop.f32.mrf.mxu1  ;;  %v202_v47 = vmul.f32 %v576_v27, %v576_v27  ;;  %v206_v61 = vmul.f32 %v578_v28, %v578_v28 }
  0xaf   :  { %v199_v35 = vmul.f32 %v580_v29, %v580_v29  ;;  %v180_v37 = vadd.f32 %v179_v33, %v580_v29 }
  0xb1   :  { %v211_v41 = vadd.f32 %v210_v36, %v199_v35 }
  0xb5   :  { %v591_v38 = vpop.f32.mrf.mxu2  ;;  %v593_v39 = vpop.f32.mrf.mxu3 }
  0xb6   :  { %v595_v40 = vpop.f32.mrf.mxu1  ;;  %v203_v50 = vmul.f32 %v591_v38, %v591_v38  ;;  %v207_v0 = vmul.f32 %v593_v39, %v593_v39 }
  0xb7   :  { %v181_v42 = vadd.f32 %v180_v37, %v595_v40  ;;  %v200_v43 = vmul.f32 %v595_v40, %v595_v40 }
  0xb9   :  { %v182_v45 = vadd.f32 %v181_v42, %v562_v19  ;;  %v212_v46 = vadd.f32 %v211_v41, %v200_v43  ;;  %v235_v42 = vld [vmem:[%s678_s2] sm:$0x1] }
  0xbb   :  { %v213_v48 = vadd.f32 %v212_v46, %v201_v44  ;;  %v183_v49 = vadd.f32 %v182_v45, %v576_v27  ;;  %v253_v45 = vld [vmem:[%s679_s3] sm:$0x1] }
  0xbd   :  { %v608_v51 = vpop.f32.mrf.mxu2  ;;  %v184_v52 = vadd.f32 %v183_v49, %v591_v38  ;;  %v214_v53 = vadd.f32 %v213_v48, %v202_v47  ;;  %v175_v54 = vpop.f32.mrf.mxu3 }
  0xbe   :  { %v204_v56 = vmul.f32 %v608_v51, %v608_v51 }
  0xbf   :  { %v185_v55 = vadd.f32 %v184_v52, %v608_v51  ;;  %v215_v57 = vadd.f32 %v214_v53, %v203_v50 }
  0xc1   :  { %v186_v59 = vadd.f32 %v185_v55, %v564_v20  ;;  %v216_v60 = vadd.f32 %v215_v57, %v204_v56 }
  0xc3   :  { %v217_v62 = vadd.f32 %v216_v60, %v205_v58  ;;  %v187_v63 = vadd.f32 %v186_v59, %v578_v28 }
  0xc5   :  { %v188_v1 = vadd.f32 %v187_v63, %v593_v39  ;;  %v218_v2 = vadd.f32 %v217_v62, %v206_v61 }
  0xc7   :  { %v189_v3 = vrot.slane %v188_v1, 4  ;;  %v219_v4 = vadd.f32 %v218_v2, %v207_v0 }
  0xc9   :  { %v190_v5 = vadd.f32 %v189_v3, %v188_v1  ;;  %v220_v6 = vrot.slane %v219_v4, 4 }
  0xcb   :  { %v191_v7 = vrot.slane %v190_v5, 2  ;;  %v221_v8 = vadd.f32 %v220_v6, %v219_v4 }
  0xcd   :  { %v192_v9 = vadd.f32 %v191_v7, %v190_v5  ;;  %v222_v10 = vrot.slane %v221_v8, 2 }
  0xcf   :  { %v193_v11 = vrot.slane %v192_v9, 1  ;;  %v223_v12 = vadd.f32 %v222_v10, %v221_v8 }
  0xd1   :  { %v224_v13 = vrot.slane %v223_v12, 1  ;;  %v194_v14 = vadd.f32 %v193_v11, %v192_v9 }
  0xd3   :  { %v225_v15 = vadd.f32 %v224_v13, %v223_v12 }
  0xd5   :  { %v227_v16 = vsel %vm226_vm0, %v194_v14, %v225_v15 }
  0xd6   :  { %v228_v23 = vmul.f32 0.010204081, %v227_v16 }
  0xd8   :  { %v229_v24 = vmul.f32 %v228_v23, %v228_v23 }
  0xda   :  { %v231_v25 = vrot.slane %v229_v24, 7 }
  0xdc   :  { %v233_v26 = vsub.f32 %v228_v23, %v231_v25 }
  0xde   :  { %v234_v30 = vmax.f32 %v233_v26, 0.0 }
  0xe0   :  { %v236_v31 = vadd.f32 1e-05, %v234_v30 }
  0xe2   :  { %486 = vrsqrt.f32 %v236_v31  ;;  %vm243_vm2 = vweird.f32 %v236_v31 }
  0xe8   :  { %v487_v32 = vpop.eup %486 }
  0xe9   :  { %v238_v33 = vmul.f32 %v487_v32, %v236_v31  ;;  %vm244_vm1 = vweird.f32 %v487_v32 }
  0xea   :  { %vm245_vm3 = vmor %vm243_vm2, %vm244_vm1 }
  0xeb   :  { %v239_v34 = vmul.f32 %v487_v32, %v238_v33 }
  0xed   :  { %v240_v35 = vmul.f32 0.5, %v239_v34 }
  0xef   :  { %v241_v36 = vsub.f32 1.5, %v240_v35 }
  0xf1   :  { %v242_v37 = vmul.f32 %v487_v32, %v241_v36 }
  0xf3   :  { %v246_v41 = vsel %vm245_vm3, %v487_v32, %v242_v37 }
  0xf4   :  { %248 = vst [vmem:[#allocation1] sm:$0xff] %v246_v41 }
  0xfb   :  { %v250_v43 = vld [vmem:[#allocation1 + $0x1] ss:$9 sm:$0xff] }
  0xfc   :  { %v252_v44 = vmul.f32 %v250_v43, %v235_v42 }
  0xfe   :  { %v254_v46 = vmul.f32 %v252_v44, %v228_v23  ;;  %v257_v47 = vperm.slane %v252_v44, 0 }
 0x100   :  { %v255_v48 = vsub.f32 %v253_v45, %v254_v46  ;;  %v259_v49 = vmul.f32 %v257_v47, %v558_v17  ;;  %v260_v50 = vmul.f32 %v257_v47, %v566_v21  ;;  %v261_v52 = vmul.f32 %v257_v47, %v560_v18 }
 0x101   :  { %v262_v53 = vmul.f32 %v257_v47, %v568_v22  ;;  %v263_v54 = vmul.f32 %v257_v47, %v580_v29  ;;  %v264_v55 = vmul.f32 %v257_v47, %v595_v40  ;;  %v265_v56 = vmul.f32 %v257_v47, %v562_v19 }
 0x102   :  { %v266_v57 = vmul.f32 %v257_v47, %v576_v27  ;;  %v267_v58 = vmul.f32 %v257_v47, %v591_v38  ;;  %v273_v59 = vperm.slane %v255_v48, 0  ;;  %v268_v60 = vmul.f32 %v257_v47, %v608_v51 }
 0x103   :  { %v269_v17 = vmul.f32 %v257_v47, %v564_v20  ;;  %v270_v21 = vmul.f32 %v257_v47, %v578_v28  ;;  %v271_v18 = vmul.f32 %v257_v47, %v593_v39 }
 0x104   :  { %v275_v22 = vadd.f32 %v273_v59, %v259_v49  ;;  %v276_v61 = vadd.f32 %v273_v59, %v260_v50  ;;  %v277_v29 = vadd.f32 %v273_v59, %v261_v52  ;;  %v278_v62 = vadd.f32 %v273_v59, %v262_v53 }
 0x105   :  { %v279_v40 = vadd.f32 %v273_v59, %v263_v54  ;;  %v280_v63 = vadd.f32 %v273_v59, %v264_v55  ;;  %v281_v19 = vadd.f32 %v273_v59, %v265_v56  ;;  %v282_v0 = vadd.f32 %v273_v59, %v266_v57 }
 0x106   :  { %v283_v27 = vadd.f32 %v273_v59, %v267_v58  ;;  %v284_v1 = vadd.f32 %v273_v59, %v268_v60  ;;  %v285_v38 = vadd.f32 %v273_v59, %v269_v17  ;;  %v286_v2 = vadd.f32 %v273_v59, %v270_v21 }
 0x107   :  { %v287_v3 = vadd.f32 %v273_v59, %v271_v18  ;;  %vm288_vm4 = vcmp.gt.f32.partialorder %v275_v22, 0.0  ;;  %vm289_vm5 = vcmp.gt.f32.partialorder %v276_v61, 0.0  ;;  %vm290_vm6 = vcmp.gt.f32.partialorder %v277_v29, 0.0 }
 0x108   :  { %vm291_vm7 = vcmp.gt.f32.partialorder %v278_v62, 0.0  ;;  %vm292_vm8 = vcmp.gt.f32.partialorder %v279_v40, 0.0  ;;  %vm293_vm9 = vcmp.gt.f32.partialorder %v280_v63, 0.0  ;;  %vm294_vm10 = vcmp.gt.f32.partialorder %v281_v19, 0.0 }
 0x109   :  { %vm295_vm11 = vcmp.gt.f32.partialorder %v282_v0, 0.0  ;;  %vm296_vm12 = vcmp.gt.f32.partialorder %v283_v27, 0.0  ;;  %vm297_vm13 = vcmp.gt.f32.partialorder %v284_v1, 0.0  ;;  %vm298_vm14 = vcmp.gt.f32.partialorder %v285_v38, 0.0 }
 0x10a   :  { %vm299_vm15 = vcmp.gt.f32.partialorder %v286_v2, 0.0  ;;  %vm300_vm0 = vcmp.gt.f32.partialorder %v287_v3, 0.0  ;;  %v301_v20 = vmul.f32 0.01, %v275_v22  ;;  %v302_v28 = vmul.f32 0.01, %v276_v61 }
 0x10b   :  { %v303_v39 = vmul.f32 0.01, %v277_v29  ;;  %v304_v51 = vmul.f32 0.01, %v278_v62  ;;  %v305_v4 = vmul.f32 0.01, %v279_v40 }
 0x10c   :  { %v306_v5 = vmul.f32 0.01, %v280_v63  ;;  %v307_v6 = vmul.f32 0.01, %v281_v19  ;;  %v308_v7 = vmul.f32 0.01, %v282_v0  ;;  %v314_v8 = vsel %vm288_vm4, %v275_v22, %v301_v20 }
 0x10d   :  { %v309_v9 = vmul.f32 0.01, %v283_v27  ;;  %v310_v10 = vmul.f32 0.01, %v284_v1  ;;  %v311_v11 = vmul.f32 0.01, %v285_v38  ;;  %v315_v12 = vsel %vm289_vm5, %v276_v61, %v302_v28 }
 0x10e   :  { %v312_v13 = vmul.f32 0.01, %v286_v2  ;;  %v313_v14 = vmul.f32 0.01, %v287_v3  ;;  %v316_v15 = vsel %vm290_vm6, %v277_v29, %v303_v39  ;;  %v317_v16 = vsel %vm291_vm7, %v278_v62, %v304_v51 }
 0x10f   :  { %v318_v23 = vsel %vm292_vm8, %v279_v40, %v305_v4  ;;  %v319_v24 = vsel %vm293_vm9, %v280_v63, %v306_v5  ;;  %v320_v25 = vsel %vm294_vm10, %v281_v19, %v307_v6  ;;  %v321_v26 = vsel %vm295_vm11, %v282_v0, %v308_v7 }
 0x110   :  { %v322_v30 = vsel %vm296_vm12, %v283_v27, %v309_v9  ;;  %v323_v31 = vsel %vm297_vm13, %v284_v1, %v310_v10  ;;  %v324_v32 = vsel %vm298_vm14, %v285_v38, %v311_v11  ;;  %v325_v33 = vsel %vm299_vm15, %v286_v2, %v312_v13 }
 0x111   :  { %v430_v34 = vpack.c.bf16 %v315_v12, %v314_v8  ;;  %v435_v35 = vpack.c.bf16 %v317_v16, %v316_v15  ;;  %v440_v36 = vpack.c.bf16 %v319_v24, %v318_v23  ;;  %v326_v37 = vsel %vm300_vm0, %v287_v3, %v313_v14 }
 0x112   :  { %v445_v41 = vpack.c.bf16 %v321_v26, %v320_v25  ;;  %v450_v42 = vpack.c.bf16 %v323_v31, %v322_v30  ;;  %v455_v43 = vpack.c.bf16 %v325_v33, %v324_v32  ;;  %v339_v44 = vpack.c.bf16 %v326_v37, %v326_v37 }
 0x113   :  { %431 = vst [vmem:[%s680_s4] sm:$0xff] %v430_v34  }
 0x114   :  { %457 = vst [vmem:[%s680_s4 + $0x8] sm:$0xff] %v435_v35  }
 0x115   :  { %458 = vst [vmem:[%s680_s4 + $0x10] sm:$0xff] %v440_v36  }
 0x116   :  { %459 = vst [vmem:[%s680_s4 + $0x18] sm:$0xff] %v445_v41  }
 0x117   :  { %460 = vst [vmem:[%s680_s4 + $0x20] sm:$0xff] %v450_v42  }
 0x118   :  { %461 = vst [vmem:[%s680_s4 + $0x28] sm:$0xff] %v455_v43  }
 0x119   :  { %352 = vst [vmem:[%s680_s4 + $0x30] sm:$0xf] %v339_v44 }

// kernel: vae_forward.11
= control target key start
LH: loop header
LB: loop body
LE: loop exit
PB: predicated region body
PF: predicated region fallthrough
CT: control target
= control target key end

     0   :  { %s269_s1 = inlined_call_operand.vmem [shape: bf16[128,128], index: 1, kind: input, shape index: {}]   ;;  %s270_s2 = inlined_call_operand.vmem [shape: f32[1,128], index: 2, kind: input, shape index: {}]   ;;  %s271_s3 = inlined_call_operand.vmem [shape: f32[1,128], index: 3, kind: input, shape index: {}]   ;;  %s272_s0 = inlined_call_operand.vmem [shape: bf16[32,128], index: 0, kind: input, shape index: {}]   ;;  %s273_s4 = inlined_call_operand.vmem [shape: f32[32,128], index: 4, kind: output, shape index: {}]  }
   0x1   :  { %v181_v0 = vld [vmem:[%s269_s1 + $0x38] sm:$0xff]  ;;  %v180_v1 = vld [vmem:[%s269_s1 + $0x30] sm:$0xff]  ;;  %v179_v2 = vld [vmem:[%s269_s1 + $0x28] sm:$0xff] }
   0x2   :  { %101 = vmatpush.bf16.msra.mxu0 %v181_v0  ;;  %182 = vmatpush.bf16.msra.mxu1 %v181_v0  ;;  %v178_v3 = vld [vmem:[%s269_s1 + $0x20] sm:$0xff]  ;;  %v177_v4 = vld [vmem:[%s269_s1 + $0x18] sm:$0xff]  ;;  %v176_v5 = vld [vmem:[%s269_s1 + $0x10] sm:$0xff] }
   0x3   :  { %v175_v6 = vld [vmem:[%s269_s1 + $0x8] sm:$0xff]  ;;  %v174_v7 = vld [vmem:[%s269_s1] sm:$0xff] }
   0x4   :  { %v172_v8 = vld [vmem:[%s272_s0] sm:$0xff]  ;;  %v173_v9 = vld [vmem:[%s272_s0 + $0x8] sm:$0xff] }
   0x5   :  { %v190_v10 = vld [vmem:[%s271_s3] ss:$0 sm:$0xff] }
   0x6   :  { %102 = vmatpush.bf16.msra.mxu0 %v180_v1  ;;  %183 = vmatpush.bf16.msra.mxu1 %v180_v1 }
   0xa   :  { %103 = vmatpush.bf16.msra.mxu0 %v179_v2  ;;  %184 = vmatpush.bf16.msra.mxu1 %v179_v2 }
   0xe   :  { %104 = vmatpush.bf16.msra.mxu0 %v178_v3  ;;  %185 = vmatpush.bf16.msra.mxu1 %v178_v3 }
  0x12   :  { %105 = vmatpush.bf16.msra.mxu0 %v177_v4  ;;  %186 = vmatpush.bf16.msra.mxu1 %v177_v4 }
  0x16   :  { %106 = vmatpush.bf16.msra.mxu0 %v176_v5  ;;  %187 = vmatpush.bf16.msra.mxu1 %v176_v5 }
  0x1a   :  { %107 = vmatpush.bf16.msra.mxu0 %v175_v6  ;;  %188 = vmatpush.bf16.msra.mxu1 %v175_v6 }
  0x1e   :  { %108 = vmatpush.bf16.msra.mxu0 %v174_v7  ;;  %189 = vmatpush.bf16.msra.mxu1 %v174_v7 }
  0x21   :  { %109 = vmatmul.bf16.vlgmr.msra.gmra.mxu0 %v172_v8  ;;  %114 = vmatmul.bf16.vlgmr.msra.gmra.mxu1 %v173_v9 }
  0x9e   :  { %v110_v11 = vpop.f32.mrf.mxu0  ;;  %v115_v12 = vpop.f32.mrf.mxu1 }
  0x9f   :  { %v111_v13 = vadd.f32 %v190_v10, %v110_v11  ;;  %v116_v14 = vadd.f32 %v190_v10, %v115_v12 }
  0xa1   :  { %191 = vtanh.f32 %v111_v13 }
  0xa2   :  { %193 = vtanh.f32 %v116_v14 }
  0xa6   :  { %v112_v15 = vpop.f32.mrf.mxu0  ;;  %v117_v16 = vpop.f32.mrf.mxu1 }
  0xa7   :  { %v192_v17 = vpop.eup %191  ;;  %v113_v18 = vadd.f32 %v190_v10, %v112_v15  ;;  %v118_v19 = vadd.f32 %v190_v10, %v117_v16 }
  0xa8   :  { %v194_v20 = vpop.eup %193  ;;  %124 = vst [vmem:[%s273_s4] sm:$0xff] %v192_v17 }
  0xa9   :  { %126 = vst [vmem:[%s273_s4 + $0x10] sm:$0xff] %v194_v20  ;;  %195 = vtanh.f32 %v113_v18 }
  0xaa   :  { %197 = vtanh.f32 %v118_v19 }
  0xaf   :  { %v196_v21 = vpop.eup %195 }
  0xb0   :  { %v198_v22 = vpop.eup %197  ;;  %125 = vst [vmem:[%s273_s4 + $0x8] sm:$0xff] %v196_v21 }
  0xb1   :  { %127 = vst [vmem:[%s273_s4 + $0x18] sm:$0xff] %v198_v22 }

</bundles_post_ra>
